<compile_context>
chip_gen: v5e
topology: v5e:2x2
jax: 0.10.0
libtpu: 0.0.40
codegen_flags: <defaults>
</compile_context>

<pallas_src>
import jax
import jax.numpy as jnp
from jax.experimental import pallas as pl
from jax.experimental.pallas import tpu as pltpu

BN_EPS = 1e-5


def _round_up(x, m):
    return (x + m - 1) // m * m


def make_msfe_kernel(dilations, Cg, P, Wp, Lv_pad, count):
    inv_cnt = 1.0 / float(count)

    def kernel(w_ref, x_ref, mask_ref, prm_ref, o_ref,
               slab_ref, cache_ref, sum_ref, ssq_ref):
        # w_ref   : (C, 27*Cg) block-diagonal conv weights (col order: branch, tap, ci)
        # x_ref   : (1, C, Lp) flat padded sample (row stride Wp)
        # mask_ref: (1, Lv_pad) 1.0 at valid output columns, else 0.0
        # prm_ref : (3, C, 1)  [gamma, beta, prelu_slope]
        # o_ref   : (1, C, Lv_pad)
        # slab_ref: (27*Cg, Lv_pad) VMEM tap slab (in-kernel im2col)
        # cache_ref: (N, C, Lv_pad) resident conv results
        # sum_ref / ssq_ref: (C, 1) persistent BN statistics
        p = pl.program_id(0)
        n = pl.program_id(1)
        mask = mask_ref[...]                                   # (1, Lv_pad)

        # ---------------- phase 0: conv (in-kernel im2col + one MXU matmul) + sums
        @pl.when(p == 0)
        def _():
            @pl.when(n == 0)
            def _():
                sum_ref[...] = jnp.zeros_like(sum_ref)
                ssq_ref[...] = jnp.zeros_like(ssq_ref)

            xg = x_ref[0]                                      # (C, Lp)
            for b, d in enumerate(dilations):
                for ky in range(3):
                    for kx in range(3):
                        s = (P + (ky - 1) * d) * Wp + (P + (kx - 1) * d)
                        r0 = (b * 9 + ky * 3 + kx) * Cg
                        slab_ref[r0:r0 + Cg, :] = \
                            xg[b * Cg:(b + 1) * Cg, s:s + Lv_pad]

            acc = jnp.dot(w_ref[...], slab_ref[...],
                          preferred_element_type=jnp.float32,
                          precision=jax.lax.Precision.HIGHEST)   # (C, Lv_pad)
            cache_ref[n] = acc
            sum_ref[...] += jnp.sum(acc * mask, axis=1, keepdims=True)

        # ---------------- phase 1: centered sum of squares (numerically safe variance)
        @pl.when(p == 1)
        def _():
            acc = cache_ref[n]
            mean = sum_ref[...] * inv_cnt
            dlt = (acc - mean) * mask
            ssq_ref[...] += jnp.sum(dlt * dlt, axis=1, keepdims=True)

        # ---------------- phase 2: normalize + affine + PReLU, lane-dense store
        @pl.when(p == 2)
        def _():
            acc = cache_ref[n]
            mean = sum_ref[...] * inv_cnt
            var = ssq_ref[...] * inv_cnt
            inv = jax.lax.rsqrt(var + BN_EPS)
            scale = inv * prm_ref[0]                           # gamma * rsqrt(var+eps)
            shift = prm_ref[1] - mean * scale                  # beta  - mean*scale
            yn = acc * scale + shift
            o_ref[0] = jnp.where(yn >= 0.0, yn, yn * prm_ref[2])

    return kernel


def msfe_forward(x_nchw, branch_params, dilations=(3, 5, 7)):
    """MSFE.forward. x_nchw: (N, dim, H, W); branch_params: [(w, b, gamma, beta, slope)]*3."""
    N, C, H, W = x_nchw.shape
    nb = len(dilations)
    Cg = C // nb
    K = 9 * Cg
    P = max(dilations)                     # pad ONCE to the largest dilation
    Hp, Wp = H + 2 * P, W + 2 * P
    Lv = (H - 1) * Wp + W                  # contiguous flat span covering every output
    Lv_pad = _round_up(Lv, 128)            # lane-dense stores / aligned matmul width
    s_max = 2 * P * Wp + 2 * P             # largest in-kernel tap offset
    Lp = _round_up(s_max + Lv_pad, 128)

    # ---- layout glue: pad once, flatten rows (no channel transpose -- groups are
    #      already contiguous channels), zero-extend the tail so all tap slices fit.
    xp = jnp.pad(x_nchw.astype(jnp.float32), ((0, 0), (0, 0), (P, P), (P, P)))
    x_flat = xp.reshape(N, C, Hp * Wp)
    x_flat = jnp.pad(x_flat, ((0, 0), (0, 0), (0, Lp - Hp * Wp)))       # (N, C, Lp)

    # valid-output-column mask over the Lv_pad flat positions (j = h*Wp + w)
    j = jnp.arange(Lv_pad, dtype=jnp.int32)
    mask = (((j % Wp) < W) & (j < Lv)).astype(jnp.float32)[None, :]     # (1, Lv_pad)

    # block-diagonal conv weights; column order (tap, ci) matches the in-kernel slab.
    # Conv bias is intentionally dropped: it cancels exactly under training-mode BN.
    w_bd = jnp.zeros((C, nb * K), jnp.float32)
    gamma_l, beta_l, slope_l = [], [], []
    for b, (w, _bias, gamma, beta, slope) in enumerate(branch_params):
        wb = jnp.transpose(w.astype(jnp.float32), (0, 2, 3, 1)).reshape(Cg, K)
        w_bd = w_bd.at[b * Cg:(b + 1) * Cg, b * K:(b + 1) * K].set(wb)
        gamma_l.append(gamma.astype(jnp.float32))
        beta_l.append(beta.astype(jnp.float32))
        slope_l.append(jnp.full((Cg,), slope, jnp.float32))
    params = jnp.stack([jnp.concatenate(gamma_l),
                        jnp.concatenate(beta_l),
                        jnp.concatenate(slope_l)], axis=0)[:, :, None]  # (3, C, 1)

    kernel = make_msfe_kernel(dilations, Cg, P, Wp, Lv_pad, N * H * W)
    y = pl.pallas_call(
        kernel,
        out_shape=jax.ShapeDtypeStruct((N, C, Lv_pad), jnp.float32),
        grid=(3, N),                                       # (phase, sample)
        in_specs=[
            pl.BlockSpec((C, nb * K), lambda p, n: (0, 0)),
            # input blocks are only fetched during phase 0
            pl.BlockSpec((1, C, Lp), lambda p, n: (jnp.where(p == 0, n, 0), 0, 0)),
            pl.BlockSpec((1, Lv_pad), lambda p, n: (0, 0)),
            pl.BlockSpec((3, C, 1), lambda p, n: (0, 0, 0)),
        ],
        out_specs=pl.BlockSpec((1, C, Lv_pad),
                               lambda p, n: (jnp.where(p == 2, n, 0), 0, 0)),
        scratch_shapes=[
            pltpu.VMEM((nb * K, Lv_pad), jnp.float32),     # tap slab (im2col in VMEM)
            pltpu.VMEM((N, C, Lv_pad), jnp.float32),       # resident conv cache
            pltpu.VMEM((C, 1), jnp.float32),               # per-channel sum
            pltpu.VMEM((C, 1), jnp.float32),               # per-channel centered ssq
        ],
        compiler_params=pltpu.CompilerParams(
            dimension_semantics=("arbitrary", "arbitrary")),
    )(w_bd, x_flat, mask, params)

    # crop the flat padded layout back to (N, C, H, W): out[n,c,h,w] = y[n,c,h*Wp+w]
    need = H * Wp
    if need > Lv_pad:
        y = jnp.pad(y, ((0, 0), (0, 0), (0, need - Lv_pad)))
    return y[:, :, :need].reshape(N, C, H, Wp)[:, :, :, :W]


def branch_reference(x_group_nchw, w, b, gamma, beta, slope, d):
    """Pure-JAX reference for one branch (conv -> training-mode BN -> PReLU)."""
    y = jax.lax.conv_general_dilated(
        x_group_nchw, w, window_strides=(1, 1),
        padding=((d, d), (d, d)), rhs_dilation=(d, d),
        dimension_numbers=("NCHW", "OIHW", "NCHW"),
        precision=jax.lax.Precision.HIGHEST)
    y = y + b[None, :, None, None]
    mean = jnp.mean(y, axis=(0, 2, 3), keepdims=True)
    var = jnp.mean((y - mean) ** 2, axis=(0, 2, 3), keepdims=True)
    yn = (y - mean) * jax.lax.rsqrt(var + BN_EPS) * gamma[None, :, None, None] \
         + beta[None, :, None, None]
    return jnp.where(yn >= 0.0, yn, slope * yn)


if __name__ == "__main__":
    key = jax.random.PRNGKey(0)
    N, dim, H, W = 2, 12, 16, 16          # dim divisible by 3 -> 3 groups of 4 channels
    Cg = dim // 3
    dilations = (3, 5, 7)

    keys = jax.random.split(key, 1 + len(dilations))
    x = jax.random.normal(keys[0], (N, dim, H, W), dtype=jnp.float32)

    branch_params = []
    for i in range(len(dilations)):
        kw, kb, kg, kbeta = jax.random.split(keys[1 + i], 4)
        w = 0.2 * jax.random.normal(kw, (Cg, Cg, 3, 3), dtype=jnp.float32)
        b = 0.1 * jax.random.normal(kb, (Cg,), dtype=jnp.float32)
        gamma = 1.0 + 0.1 * jax.random.normal(kg, (Cg,), dtype=jnp.float32)
        beta = 0.1 * jax.random.normal(kbeta, (Cg,), dtype=jnp.float32)
        slope = jnp.float32(0.25)          # nn.PReLU() default init (shared scalar)
        branch_params.append((w, b, gamma, beta, slope))

    out = msfe_forward(x, branch_params, dilations)
    out = jax.block_until_ready(out)
    assert out.shape == (N, dim, H, W), out.shape

    # Correctness check against a pure-JAX reference (bias kept in the reference; it
    # cancels exactly under training-mode BatchNorm so the kernel omits it).
    refs = []
    for gi, (d, p) in enumerate(zip(dilations, branch_params)):
        xg = x[:, gi * Cg:(gi + 1) * Cg]
        refs.append(branch_reference(xg, *p, d))
    ref = jnp.concatenate(refs, axis=1)
    assert jnp.allclose(out, ref, atol=1e-4, rtol=1e-4), \
        float(jnp.max(jnp.abs(out - ref)))

    print("KERNEL_OK")
</pallas_src>

<mosaic_0001>
module attributes {stable_mosaic.version = 11 : i64} {
  func.func @kernel(%arg0: i32, %arg1: i32, %arg2: memref<12x108xf32, #tpu.memory_space<vmem>>, %arg3: memref<1x12x1024xf32, #tpu.memory_space<vmem>>, %arg4: memref<1x512xf32, #tpu.memory_space<vmem>>, %arg5: memref<3x12x1xf32, #tpu.memory_space<vmem>>, %arg6: memref<1x12x512xf32, #tpu.memory_space<vmem>>, %arg7: memref<108x512xf32, #tpu.memory_space<vmem>>, %arg8: memref<2x12x512xf32, #tpu.memory_space<vmem>>, %arg9: memref<12x1xf32, #tpu.memory_space<vmem>>, %arg10: memref<12x1xf32, #tpu.memory_space<vmem>>) attributes {dimension_semantics = [#tpu.dimension_semantics<arbitrary>, #tpu.dimension_semantics<arbitrary>], iteration_bounds = array<i64: 3, 2>, scalar_prefetch = 0 : i64, scratch_operands = 4 : i64, tpu.core_type = #tpu.core_type<tc>, window_params = [{pipeline_mode = #tpu.pipeline_mode<synchronous>, transform_indices = @transform_0, window_bounds = array<i64: 12, 108>}, {transform_indices = @transform_1, window_bounds = array<i64: 1, 12, 1024>}, {pipeline_mode = #tpu.pipeline_mode<synchronous>, transform_indices = @transform_2, window_bounds = array<i64: 1, 512>}, {pipeline_mode = #tpu.pipeline_mode<synchronous>, transform_indices = @transform_3, window_bounds = array<i64: 3, 12, 1>}, {transform_indices = @transform_4, window_bounds = array<i64: 1, 12, 512>}]} {
    %c0 = arith.constant 0 : index
    %c0_0 = arith.constant 0 : index
    %0 = vector.load %arg4[%c0, %c0_0] : memref<1x512xf32, #tpu.memory_space<vmem>>, vector<1x512xf32>
    %c0_i32 = arith.constant 0 : i32
    %1 = arith.cmpi eq, %arg0, %c0_i32 : i32
    %2 = arith.extui %1 : i1 to i32
    %c0_i32_1 = arith.constant 0 : i32
    %3 = arith.cmpi ne, %2, %c0_i32_1 : i32
    scf.if %3 {
      %c0_i32_4 = arith.constant 0 : i32
      %10 = arith.cmpi eq, %arg1, %c0_i32_4 : i32
      %11 = arith.extui %10 : i1 to i32
      %c0_i32_5 = arith.constant 0 : i32
      %12 = arith.cmpi ne, %11, %c0_i32_5 : i32
      scf.if %12 {
        %cst_48 = arith.constant 0.000000e+00 : f32
        %83 = vector.broadcast %cst_48 : f32 to vector<12x1xf32>
        %c0_49 = arith.constant 0 : index
        %c0_50 = arith.constant 0 : index
        %84 = vector.load %arg9[%c0_49, %c0_50] : memref<12x1xf32, #tpu.memory_space<vmem>>, vector<12x1xf32>
        tpu.vector_store %arg9[%c0_49, %c0_50], %83 {strides = array<i32>} : memref<12x1xf32, #tpu.memory_space<vmem>>, vector<12x1xf32>,
        %cst_51 = arith.constant 0.000000e+00 : f32
        %85 = vector.broadcast %cst_51 : f32 to vector<12x1xf32>
        %c0_52 = arith.constant 0 : index
        %c0_53 = arith.constant 0 : index
        %86 = vector.load %arg10[%c0_52, %c0_53] : memref<12x1xf32, #tpu.memory_space<vmem>>, vector<12x1xf32>
        tpu.vector_store %arg10[%c0_52, %c0_53], %85 {strides = array<i32>} : memref<12x1xf32, #tpu.memory_space<vmem>>, vector<12x1xf32>,
      } else {
      }
      %c0_6 = arith.constant 0 : index
      %c0_7 = arith.constant 0 : index
      %c0_8 = arith.constant 0 : index
      %13 = vector.load %arg3[%c0_6, %c0_7, %c0_8] : memref<1x12x1024xf32, #tpu.memory_space<vmem>>, vector<1x12x1024xf32>
      %14 = vector.shape_cast %13 : vector<1x12x1024xf32> to vector<12x1024xf32>
      %15 = vector.extract_strided_slice %14 {offsets = [0, 124], sizes = [4, 512], strides = [1, 1]} : vector<12x1024xf32> to vector<4x512xf32>
      %c0_9 = arith.constant 0 : index
      %c0_10 = arith.constant 0 : index
      %16 = vector.load %arg7[%c0_9, %c0_10] : memref<108x512xf32, #tpu.memory_space<vmem>>, vector<4x512xf32>
      tpu.vector_store %arg7[%c0_9, %c0_10], %15 {strides = array<i32>} : memref<108x512xf32, #tpu.memory_space<vmem>>, vector<4x512xf32>,
      %17 = vector.extract_strided_slice %14 {offsets = [0, 127], sizes = [4, 512], strides = [1, 1]} : vector<12x1024xf32> to vector<4x512xf32>
      %c4 = arith.constant 4 : index
      %c0_11 = arith.constant 0 : index
      %18 = vector.load %arg7[%c4, %c0_11] : memref<108x512xf32, #tpu.memory_space<vmem>>, vector<4x512xf32>
      tpu.vector_store %arg7[%c4, %c0_11], %17 {strides = array<i32>} : memref<108x512xf32, #tpu.memory_space<vmem>>, vector<4x512xf32>,
      %19 = vector.extract_strided_slice %14 {offsets = [0, 130], sizes = [4, 512], strides = [1, 1]} : vector<12x1024xf32> to vector<4x512xf32>
      %c8 = arith.constant 8 : index
      %c0_12 = arith.constant 0 : index
      %20 = vector.load %arg7[%c8, %c0_12] : memref<108x512xf32, #tpu.memory_space<vmem>>, vector<4x512xf32>
      tpu.vector_store %arg7[%c8, %c0_12], %19 {strides = array<i32>} : memref<108x512xf32, #tpu.memory_space<vmem>>, vector<4x512xf32>,
      %21 = vector.extract_strided_slice %14 {offsets = [0, 214], sizes = [4, 512], strides = [1, 1]} : vector<12x1024xf32> to vector<4x512xf32>
      %c12 = arith.constant 12 : index
      %c0_13 = arith.constant 0 : index
      %22 = vector.load %arg7[%c12, %c0_13] : memref<108x512xf32, #tpu.memory_space<vmem>>, vector<4x512xf32>
      tpu.vector_store %arg7[%c12, %c0_13], %21 {strides = array<i32>} : memref<108x512xf32, #tpu.memory_space<vmem>>, vector<4x512xf32>,
      %23 = vector.extract_strided_slice %14 {offsets = [0, 217], sizes = [4, 512], strides = [1, 1]} : vector<12x1024xf32> to vector<4x512xf32>
      %c16 = arith.constant 16 : index
      %c0_14 = arith.constant 0 : index
      %24 = vector.load %arg7[%c16, %c0_14] : memref<108x512xf32, #tpu.memory_space<vmem>>, vector<4x512xf32>
      tpu.vector_store %arg7[%c16, %c0_14], %23 {strides = array<i32>} : memref<108x512xf32, #tpu.memory_space<vmem>>, vector<4x512xf32>,
      %25 = vector.extract_strided_slice %14 {offsets = [0, 220], sizes = [4, 512], strides = [1, 1]} : vector<12x1024xf32> to vector<4x512xf32>
      %c20 = arith.constant 20 : index
      %c0_15 = arith.constant 0 : index
      %26 = vector.load %arg7[%c20, %c0_15] : memref<108x512xf32, #tpu.memory_space<vmem>>, vector<4x512xf32>
      tpu.vector_store %arg7[%c20, %c0_15], %25 {strides = array<i32>} : memref<108x512xf32, #tpu.memory_space<vmem>>, vector<4x512xf32>,
      %27 = vector.extract_strided_slice %14 {offsets = [0, 304], sizes = [4, 512], strides = [1, 1]} : vector<12x1024xf32> to vector<4x512xf32>
      %c24 = arith.constant 24 : index
      %c0_16 = arith.constant 0 : index
      %28 = vector.load %arg7[%c24, %c0_16] : memref<108x512xf32, #tpu.memory_space<vmem>>, vector<4x512xf32>
      tpu.vector_store %arg7[%c24, %c0_16], %27 {strides = array<i32>} : memref<108x512xf32, #tpu.memory_space<vmem>>, vector<4x512xf32>,
      %29 = vector.extract_strided_slice %14 {offsets = [0, 307], sizes = [4, 512], strides = [1, 1]} : vector<12x1024xf32> to vector<4x512xf32>
      %c28 = arith.constant 28 : index
      %c0_17 = arith.constant 0 : index
      %30 = vector.load %arg7[%c28, %c0_17] : memref<108x512xf32, #tpu.memory_space<vmem>>, vector<4x512xf32>
      tpu.vector_store %arg7[%c28, %c0_17], %29 {strides = array<i32>} : memref<108x512xf32, #tpu.memory_space<vmem>>, vector<4x512xf32>,
      %31 = vector.extract_strided_slice %14 {offsets = [0, 310], sizes = [4, 512], strides = [1, 1]} : vector<12x1024xf32> to vector<4x512xf32>
      %c32 = arith.constant 32 : index
      %c0_18 = arith.constant 0 : index
      %32 = vector.load %arg7[%c32, %c0_18] : memref<108x512xf32, #tpu.memory_space<vmem>>, vector<4x512xf32>
      tpu.vector_store %arg7[%c32, %c0_18], %31 {strides = array<i32>} : memref<108x512xf32, #tpu.memory_space<vmem>>, vector<4x512xf32>,
      %33 = vector.extract_strided_slice %14 {offsets = [4, 62], sizes = [4, 512], strides = [1, 1]} : vector<12x1024xf32> to vector<4x512xf32>
      %c36 = arith.constant 36 : index
      %c0_19 = arith.constant 0 : index
      %34 = vector.load %arg7[%c36, %c0_19] : memref<108x512xf32, #tpu.memory_space<vmem>>, vector<4x512xf32>
      tpu.vector_store %arg7[%c36, %c0_19], %33 {strides = array<i32>} : memref<108x512xf32, #tpu.memory_space<vmem>>, vector<4x512xf32>,
      %35 = vector.extract_strided_slice %14 {offsets = [4, 67], sizes = [4, 512], strides = [1, 1]} : vector<12x1024xf32> to vector<4x512xf32>
      %c40 = arith.constant 40 : index
      %c0_20 = arith.constant 0 : index
      %36 = vector.load %arg7[%c40, %c0_20] : memref<108x512xf32, #tpu.memory_space<vmem>>, vector<4x512xf32>
      tpu.vector_store %arg7[%c40, %c0_20], %35 {strides = array<i32>} : memref<108x512xf32, #tpu.memory_space<vmem>>, vector<4x512xf32>,
      %37 = vector.extract_strided_slice %14 {offsets = [4, 72], sizes = [4, 512], strides = [1, 1]} : vector<12x1024xf32> to vector<4x512xf32>
      %c44 = arith.constant 44 : index
      %c0_21 = arith.constant 0 : index
      %38 = vector.load %arg7[%c44, %c0_21] : memref<108x512xf32, #tpu.memory_space<vmem>>, vector<4x512xf32>
      tpu.vector_store %arg7[%c44, %c0_21], %37 {strides = array<i32>} : memref<108x512xf32, #tpu.memory_space<vmem>>, vector<4x512xf32>,
      %39 = vector.extract_strided_slice %14 {offsets = [4, 212], sizes = [4, 512], strides = [1, 1]} : vector<12x1024xf32> to vector<4x512xf32>
      %c48 = arith.constant 48 : index
      %c0_22 = arith.constant 0 : index
      %40 = vector.load %arg7[%c48, %c0_22] : memref<108x512xf32, #tpu.memory_space<vmem>>, vector<4x512xf32>
      tpu.vector_store %arg7[%c48, %c0_22], %39 {strides = array<i32>} : memref<108x512xf32, #tpu.memory_space<vmem>>, vector<4x512xf32>,
      %41 = vector.extract_strided_slice %14 {offsets = [4, 217], sizes = [4, 512], strides = [1, 1]} : vector<12x1024xf32> to vector<4x512xf32>
      %c52 = arith.constant 52 : index
      %c0_23 = arith.constant 0 : index
      %42 = vector.load %arg7[%c52, %c0_23] : memref<108x512xf32, #tpu.memory_space<vmem>>, vector<4x512xf32>
      tpu.vector_store %arg7[%c52, %c0_23], %41 {strides = array<i32>} : memref<108x512xf32, #tpu.memory_space<vmem>>, vector<4x512xf32>,
      %43 = vector.extract_strided_slice %14 {offsets = [4, 222], sizes = [4, 512], strides = [1, 1]} : vector<12x1024xf32> to vector<4x512xf32>
      %c56 = arith.constant 56 : index
      %c0_24 = arith.constant 0 : index
      %44 = vector.load %arg7[%c56, %c0_24] : memref<108x512xf32, #tpu.memory_space<vmem>>, vector<4x512xf32>
      tpu.vector_store %arg7[%c56, %c0_24], %43 {strides = array<i32>} : memref<108x512xf32, #tpu.memory_space<vmem>>, vector<4x512xf32>,
      %45 = vector.extract_strided_slice %14 {offsets = [4, 362], sizes = [4, 512], strides = [1, 1]} : vector<12x1024xf32> to vector<4x512xf32>
      %c60 = arith.constant 60 : index
      %c0_25 = arith.constant 0 : index
      %46 = vector.load %arg7[%c60, %c0_25] : memref<108x512xf32, #tpu.memory_space<vmem>>, vector<4x512xf32>
      tpu.vector_store %arg7[%c60, %c0_25], %45 {strides = array<i32>} : memref<108x512xf32, #tpu.memory_space<vmem>>, vector<4x512xf32>,
      %47 = vector.extract_strided_slice %14 {offsets = [4, 367], sizes = [4, 512], strides = [1, 1]} : vector<12x1024xf32> to vector<4x512xf32>
      %c64 = arith.constant 64 : index
      %c0_26 = arith.constant 0 : index
      %48 = vector.load %arg7[%c64, %c0_26] : memref<108x512xf32, #tpu.memory_space<vmem>>, vector<4x512xf32>
      tpu.vector_store %arg7[%c64, %c0_26], %47 {strides = array<i32>} : memref<108x512xf32, #tpu.memory_space<vmem>>, vector<4x512xf32>,
      %49 = vector.extract_strided_slice %14 {offsets = [4, 372], sizes = [4, 512], strides = [1, 1]} : vector<12x1024xf32> to vector<4x512xf32>
      %c68 = arith.constant 68 : index
      %c0_27 = arith.constant 0 : index
      %50 = vector.load %arg7[%c68, %c0_27] : memref<108x512xf32, #tpu.memory_space<vmem>>, vector<4x512xf32>
      tpu.vector_store %arg7[%c68, %c0_27], %49 {strides = array<i32>} : memref<108x512xf32, #tpu.memory_space<vmem>>, vector<4x512xf32>,
      %51 = vector.extract_strided_slice %14 {offsets = [8, 0], sizes = [4, 512], strides = [1, 1]} : vector<12x1024xf32> to vector<4x512xf32>
      %c72 = arith.constant 72 : index
      %c0_28 = arith.constant 0 : index
      %52 = vector.load %arg7[%c72, %c0_28] : memref<108x512xf32, #tpu.memory_space<vmem>>, vector<4x512xf32>
      tpu.vector_store %arg7[%c72, %c0_28], %51 {strides = array<i32>} : memref<108x512xf32, #tpu.memory_space<vmem>>, vector<4x512xf32>,
      %53 = vector.extract_strided_slice %14 {offsets = [8, 7], sizes = [4, 512], strides = [1, 1]} : vector<12x1024xf32> to vector<4x512xf32>
      %c76 = arith.constant 76 : index
      %c0_29 = arith.constant 0 : index
      %54 = vector.load %arg7[%c76, %c0_29] : memref<108x512xf32, #tpu.memory_space<vmem>>, vector<4x512xf32>
      tpu.vector_store %arg7[%c76, %c0_29], %53 {strides = array<i32>} : memref<108x512xf32, #tpu.memory_space<vmem>>, vector<4x512xf32>,
      %55 = vector.extract_strided_slice %14 {offsets = [8, 14], sizes = [4, 512], strides = [1, 1]} : vector<12x1024xf32> to vector<4x512xf32>
      %c80 = arith.constant 80 : index
      %c0_30 = arith.constant 0 : index
      %56 = vector.load %arg7[%c80, %c0_30] : memref<108x512xf32, #tpu.memory_space<vmem>>, vector<4x512xf32>
      tpu.vector_store %arg7[%c80, %c0_30], %55 {strides = array<i32>} : memref<108x512xf32, #tpu.memory_space<vmem>>, vector<4x512xf32>,
      %57 = vector.extract_strided_slice %14 {offsets = [8, 210], sizes = [4, 512], strides = [1, 1]} : vector<12x1024xf32> to vector<4x512xf32>
      %c84 = arith.constant 84 : index
      %c0_31 = arith.constant 0 : index
      %58 = vector.load %arg7[%c84, %c0_31] : memref<108x512xf32, #tpu.memory_space<vmem>>, vector<4x512xf32>
      tpu.vector_store %arg7[%c84, %c0_31], %57 {strides = array<i32>} : memref<108x512xf32, #tpu.memory_space<vmem>>, vector<4x512xf32>,
      %59 = vector.extract_strided_slice %14 {offsets = [8, 217], sizes = [4, 512], strides = [1, 1]} : vector<12x1024xf32> to vector<4x512xf32>
      %c88 = arith.constant 88 : index
      %c0_32 = arith.constant 0 : index
      %60 = vector.load %arg7[%c88, %c0_32] : memref<108x512xf32, #tpu.memory_space<vmem>>, vector<4x512xf32>
      tpu.vector_store %arg7[%c88, %c0_32], %59 {strides = array<i32>} : memref<108x512xf32, #tpu.memory_space<vmem>>, vector<4x512xf32>,
      %61 = vector.extract_strided_slice %14 {offsets = [8, 224], sizes = [4, 512], strides = [1, 1]} : vector<12x1024xf32> to vector<4x512xf32>
      %c92 = arith.constant 92 : index
      %c0_33 = arith.constant 0 : index
      %62 = vector.load %arg7[%c92, %c0_33] : memref<108x512xf32, #tpu.memory_space<vmem>>, vector<4x512xf32>
      tpu.vector_store %arg7[%c92, %c0_33], %61 {strides = array<i32>} : memref<108x512xf32, #tpu.memory_space<vmem>>, vector<4x512xf32>,
      %63 = vector.extract_strided_slice %14 {offsets = [8, 420], sizes = [4, 512], strides = [1, 1]} : vector<12x1024xf32> to vector<4x512xf32>
      %c96 = arith.constant 96 : index
      %c0_34 = arith.constant 0 : index
      %64 = vector.load %arg7[%c96, %c0_34] : memref<108x512xf32, #tpu.memory_space<vmem>>, vector<4x512xf32>
      tpu.vector_store %arg7[%c96, %c0_34], %63 {strides = array<i32>} : memref<108x512xf32, #tpu.memory_space<vmem>>, vector<4x512xf32>,
      %65 = vector.extract_strided_slice %14 {offsets = [8, 427], sizes = [4, 512], strides = [1, 1]} : vector<12x1024xf32> to vector<4x512xf32>
      %c100 = arith.constant 100 : index
      %c0_35 = arith.constant 0 : index
      %66 = vector.load %arg7[%c100, %c0_35] : memref<108x512xf32, #tpu.memory_space<vmem>>, vector<4x512xf32>
      tpu.vector_store %arg7[%c100, %c0_35], %65 {strides = array<i32>} : memref<108x512xf32, #tpu.memory_space<vmem>>, vector<4x512xf32>,
      %67 = vector.extract_strided_slice %14 {offsets = [8, 434], sizes = [4, 512], strides = [1, 1]} : vector<12x1024xf32> to vector<4x512xf32>
      %c104 = arith.constant 104 : index
      %c0_36 = arith.constant 0 : index
      %68 = vector.load %arg7[%c104, %c0_36] : memref<108x512xf32, #tpu.memory_space<vmem>>, vector<4x512xf32>
      tpu.vector_store %arg7[%c104, %c0_36], %67 {strides = array<i32>} : memref<108x512xf32, #tpu.memory_space<vmem>>, vector<4x512xf32>,
      %c0_37 = arith.constant 0 : index
      %c0_38 = arith.constant 0 : index
      %69 = vector.load %arg2[%c0_37, %c0_38] : memref<12x108xf32, #tpu.memory_space<vmem>>, vector<12x108xf32>
      %c0_39 = arith.constant 0 : index
      %c0_40 = arith.constant 0 : index
      %70 = vector.load %arg7[%c0_39, %c0_40] : memref<108x512xf32, #tpu.memory_space<vmem>>, vector<108x512xf32>
      %cst = arith.constant dense<0.000000e+00> : vector<12x512xf32>
      %71 = tpu.matmul %69, %70, %cst {dimension_numbers = #tpu.dot_dimension_numbers<[1], [0], [0], [1], [0, 0, 1, 1], [], []>, precision = #tpu.contract_precision<fp32>} : vector<12x108xf32>, vector<108x512xf32>, vector<12x512xf32> -> vector<12x512xf32>
      %72 = arith.index_cast %arg1 : i32 to index
      %c0_41 = arith.constant 0 : index
      %c0_42 = arith.constant 0 : index
      %73 = vector.load %arg8[%72, %c0_41, %c0_42] : memref<2x12x512xf32, #tpu.memory_space<vmem>>, vector<1x12x512xf32>
      %74 = vector.shape_cast %73 : vector<1x12x512xf32> to vector<12x512xf32>
      %75 = vector.shape_cast %71 : vector<12x512xf32> to vector<1x12x512xf32>
      tpu.vector_store %arg8[%72, %c0_41, %c0_42], %75 {strides = array<i32>} : memref<2x12x512xf32, #tpu.memory_space<vmem>>, vector<1x12x512xf32>,
      %c0_43 = arith.constant 0 : index
      %c0_44 = arith.constant 0 : index
      %76 = vector.load %arg9[%c0_43, %c0_44] : memref<12x1xf32, #tpu.memory_space<vmem>>, vector<12x1xf32>
      %77 = vector.broadcast %0 : vector<1x512xf32> to vector<12x512xf32>
      %78 = arith.mulf %71, %77 : vector<12x512xf32>
      %cst_45 = arith.constant dense<0.000000e+00> : vector<12xf32>
      %79 = vector.multi_reduction <add>, %78, %cst_45 [1] : vector<12x512xf32> to vector<12xf32>
      %80 = vector.shape_cast %79 : vector<12xf32> to vector<12x1xf32>
      %81 = arith.addf %76, %80 : vector<12x1xf32>
      %c0_46 = arith.constant 0 : index
      %c0_47 = arith.constant 0 : index
      %82 = vector.load %arg9[%c0_46, %c0_47] : memref<12x1xf32, #tpu.memory_space<vmem>>, vector<12x1xf32>
      tpu.vector_store %arg9[%c0_46, %c0_47], %81 {strides = array<i32>} : memref<12x1xf32, #tpu.memory_space<vmem>>, vector<12x1xf32>,
    } else {
    }
    %c1_i32 = arith.constant 1 : i32
    %4 = arith.cmpi eq, %arg0, %c1_i32 : i32
    %5 = arith.extui %4 : i1 to i32
    %c0_i32_2 = arith.constant 0 : i32
    %6 = arith.cmpi ne, %5, %c0_i32_2 : i32
    scf.if %6 {
      %10 = arith.index_cast %arg1 : i32 to index
      %c0_4 = arith.constant 0 : index
      %c0_5 = arith.constant 0 : index
      %11 = vector.load %arg8[%10, %c0_4, %c0_5] : memref<2x12x512xf32, #tpu.memory_space<vmem>>, vector<1x12x512xf32>
      %12 = vector.shape_cast %11 : vector<1x12x512xf32> to vector<12x512xf32>
      %c0_6 = arith.constant 0 : index
      %c0_7 = arith.constant 0 : index
      %13 = vector.load %arg9[%c0_6, %c0_7] : memref<12x1xf32, #tpu.memory_space<vmem>>, vector<12x1xf32>
      %cst = arith.constant 0.001953125 : f32
      %14 = vector.broadcast %cst : f32 to vector<12x1xf32>
      %15 = arith.mulf %13, %14 : vector<12x1xf32>
      %16 = vector.broadcast %15 : vector<12x1xf32> to vector<12x512xf32>
      %17 = arith.subf %12, %16 : vector<12x512xf32>
      %18 = vector.broadcast %0 : vector<1x512xf32> to vector<12x512xf32>
      %19 = arith.mulf %17, %18 : vector<12x512xf32>
      %c0_8 = arith.constant 0 : index
      %c0_9 = arith.constant 0 : index
      %20 = vector.load %arg10[%c0_8, %c0_9] : memref<12x1xf32, #tpu.memory_space<vmem>>, vector<12x1xf32>
      %21 = arith.mulf %19, %19 : vector<12x512xf32>
      %cst_10 = arith.constant dense<0.000000e+00> : vector<12xf32>
      %22 = vector.multi_reduction <add>, %21, %cst_10 [1] : vector<12x512xf32> to vector<12xf32>
      %23 = vector.shape_cast %22 : vector<12xf32> to vector<12x1xf32>
      %24 = arith.addf %20, %23 : vector<12x1xf32>
      %c0_11 = arith.constant 0 : index
      %c0_12 = arith.constant 0 : index
      %25 = vector.load %arg10[%c0_11, %c0_12] : memref<12x1xf32, #tpu.memory_space<vmem>>, vector<12x1xf32>
      tpu.vector_store %arg10[%c0_11, %c0_12], %24 {strides = array<i32>} : memref<12x1xf32, #tpu.memory_space<vmem>>, vector<12x1xf32>,
    } else {
    }
    %c2_i32 = arith.constant 2 : i32
    %7 = arith.cmpi eq, %arg0, %c2_i32 : i32
    %8 = arith.extui %7 : i1 to i32
    %c0_i32_3 = arith.constant 0 : i32
    %9 = arith.cmpi ne, %8, %c0_i32_3 : i32
    scf.if %9 {
      %10 = arith.index_cast %arg1 : i32 to index
      %c0_4 = arith.constant 0 : index
      %c0_5 = arith.constant 0 : index
      %11 = vector.load %arg8[%10, %c0_4, %c0_5] : memref<2x12x512xf32, #tpu.memory_space<vmem>>, vector<1x12x512xf32>
      %12 = vector.shape_cast %11 : vector<1x12x512xf32> to vector<12x512xf32>
      %c0_6 = arith.constant 0 : index
      %c0_7 = arith.constant 0 : index
      %13 = vector.load %arg9[%c0_6, %c0_7] : memref<12x1xf32, #tpu.memory_space<vmem>>, vector<12x1xf32>
      %cst = arith.constant 0.001953125 : f32
      %14 = vector.broadcast %cst : f32 to vector<12x1xf32>
      %15 = arith.mulf %13, %14 : vector<12x1xf32>
      %c0_8 = arith.constant 0 : index
      %c0_9 = arith.constant 0 : index
      %16 = vector.load %arg10[%c0_8, %c0_9] : memref<12x1xf32, #tpu.memory_space<vmem>>, vector<12x1xf32>
      %cst_10 = arith.constant 0.001953125 : f32
      %17 = vector.broadcast %cst_10 : f32 to vector<12x1xf32>
      %18 = arith.mulf %16, %17 : vector<12x1xf32>
      %cst_11 = arith.constant 9.99999974E-6 : f32
      %19 = vector.broadcast %cst_11 : f32 to vector<12x1xf32>
      %20 = arith.addf %18, %19 : vector<12x1xf32>
      %21 = math.rsqrt %20 : vector<12x1xf32>
      %c0_12 = arith.constant 0 : index
      %c0_13 = arith.constant 0 : index
      %c0_14 = arith.constant 0 : index
      %22 = vector.load %arg5[%c0_12, %c0_13, %c0_14] : memref<3x12x1xf32, #tpu.memory_space<vmem>>, vector<1x12x1xf32>
      %23 = vector.shape_cast %22 : vector<1x12x1xf32> to vector<12x1xf32>
      %24 = arith.mulf %21, %23 : vector<12x1xf32>
      %c1 = arith.constant 1 : index
      %c0_15 = arith.constant 0 : index
      %c0_16 = arith.constant 0 : index
      %25 = vector.load %arg5[%c1, %c0_15, %c0_16] : memref<3x12x1xf32, #tpu.memory_space<vmem>>, vector<1x12x1xf32>
      %26 = vector.shape_cast %25 : vector<1x12x1xf32> to vector<12x1xf32>
      %27 = arith.mulf %15, %24 : vector<12x1xf32>
      %28 = arith.subf %26, %27 : vector<12x1xf32>
      %29 = vector.broadcast %24 : vector<12x1xf32> to vector<12x512xf32>
      %30 = arith.mulf %12, %29 : vector<12x512xf32>
      %31 = vector.broadcast %28 : vector<12x1xf32> to vector<12x512xf32>
      %32 = arith.addf %30, %31 : vector<12x512xf32>
      %cst_17 = arith.constant 0.000000e+00 : f32
      %33 = vector.broadcast %cst_17 : f32 to vector<12x512xf32>
      %34 = arith.cmpf oge, %32, %33 : vector<12x512xf32>
      %c2 = arith.constant 2 : index
      %c0_18 = arith.constant 0 : index
      %c0_19 = arith.constant 0 : index
      %35 = vector.load %arg5[%c2, %c0_18, %c0_19] : memref<3x12x1xf32, #tpu.memory_space<vmem>>, vector<1x12x1xf32>
      %36 = vector.shape_cast %35 : vector<1x12x1xf32> to vector<12x1xf32>
      %37 = vector.broadcast %36 : vector<12x1xf32> to vector<12x512xf32>
      %38 = arith.mulf %32, %37 : vector<12x512xf32>
      %39 = arith.select %34, %32, %38 : vector<12x512xi1>, vector<12x512xf32>
      %c0_20 = arith.constant 0 : index
      %c0_21 = arith.constant 0 : index
      %c0_22 = arith.constant 0 : index
      %40 = vector.load %arg6[%c0_20, %c0_21, %c0_22] : memref<1x12x512xf32, #tpu.memory_space<vmem>>, vector<1x12x512xf32>
      %41 = vector.shape_cast %40 : vector<1x12x512xf32> to vector<12x512xf32>
      %42 = vector.shape_cast %39 : vector<12x512xf32> to vector<1x12x512xf32>
      tpu.vector_store %arg6[%c0_20, %c0_21, %c0_22], %42 {strides = array<i32>} : memref<1x12x512xf32, #tpu.memory_space<vmem>>, vector<1x12x512xf32>,
    } else {
    }
    return
  }
  func.func @transform_0(%arg0: i32, %arg1: i32) -> (i32, i32) {
    %c0_i32 = arith.constant 0 : i32
    %c0_i32_0 = arith.constant 0 : i32
    %c0_i32_1 = arith.constant 0 : i32
    return %c0_i32, %c0_i32_0 : i32, i32
  }
  func.func @transform_1(%arg0: i32, %arg1: i32) -> (i32, i32, i32) {
    %c0_i32 = arith.constant 0 : i32
    %0 = arith.cmpi eq, %arg0, %c0_i32 : i32
    %c0_i32_0 = arith.constant 0 : i32
    %1 = arith.select %0, %arg1, %c0_i32_0 : i32
    %c0_i32_1 = arith.constant 0 : i32
    %c0_i32_2 = arith.constant 0 : i32
    %c0_i32_3 = arith.constant 0 : i32
    return %1, %c0_i32_1, %c0_i32_2 : i32, i32, i32
  }
  func.func @transform_2(%arg0: i32, %arg1: i32) -> (i32, i32) {
    %c0_i32 = arith.constant 0 : i32
    %c0_i32_0 = arith.constant 0 : i32
    %c0_i32_1 = arith.constant 0 : i32
    return %c0_i32, %c0_i32_0 : i32, i32
  }
  func.func @transform_3(%arg0: i32, %arg1: i32) -> (i32, i32, i32) {
    %c0_i32 = arith.constant 0 : i32
    %c0_i32_0 = arith.constant 0 : i32
    %c0_i32_1 = arith.constant 0 : i32
    %c0_i32_2 = arith.constant 0 : i32
    return %c0_i32, %c0_i32_0, %c0_i32_1 : i32, i32, i32
  }
  func.func @transform_4(%arg0: i32, %arg1: i32) -> (i32, i32, i32) {
    %c2_i32 = arith.constant 2 : i32
    %0 = arith.cmpi eq, %arg0, %c2_i32 : i32
    %c0_i32 = arith.constant 0 : i32
    %1 = arith.select %0, %arg1, %c0_i32 : i32
    %c0_i32_0 = arith.constant 0 : i32
    %c0_i32_1 = arith.constant 0 : i32
    %c0_i32_2 = arith.constant 0 : i32
    return %1, %c0_i32_0, %c0_i32_1 : i32, i32, i32
  }
}

</mosaic_0001>

<bundles_post_ra>
// kernel: tpu_custom_call.1
= control target key start
LH: loop header
LB: loop body
LE: loop exit
PB: predicated region body
PF: predicated region fallthrough
CT: control target
= control target key end

     0   :  { %s2886_s15 = smov 0   ;;  %s2888_s16 = smov 0   ;;  %s4624_s0 = inlined_call_operand.vmem [shape: f32[12,108], index: 0, kind: input, shape index: {}]   ;;  %s4625_s1 = inlined_call_operand.vmem [shape: f32[2,12,1024], index: 1, kind: input, shape index: {}]   ;;  %s4626_s2 = inlined_call_operand.vmem [shape: f32[1,512], index: 2, kind: input, shape index: {}]   ;;  %s4627_s3 = inlined_call_operand.vmem [shape: f32[3,12,1], index: 3, kind: input, shape index: {}]   ;;  %s4628_s4 = inlined_call_operand.vmem [shape: f32[2,12,512], index: 4, kind: output, shape index: {}]  }
   0x1   :  { %s2890_s17 = smov 0   ;;  %s2892_s18 = smov 0  }
   0x2   :  { %s2894_s19 = smov 0  }
   0x3 LB: > { %s23_s20 = sadd.s32 1, %s2824_s17  ;;  %s26_s21 = sadd.s32 1, %s2828_s18  ;;  %s2832_s19 = sphi %s2894_s19, %s14_s19   ;;  %s2828_s18 = sphi %s2892_s18, %s4852_s18   ;;  %s2824_s17 = sphi %s2890_s17, %s4851_s17   ;;  %s2820_s16 = sphi %s2888_s16, %s4850_s16   ;;  %s2816_s15 = sphi %s2886_s15, %s4849_s15  }
   0x4   : > { %p24_p0 = scmp.ge.s32.totalorder %s23_s20, 2  ;;  %p2692_p1 = scmp.ge.s32.totalorder %s2832_s19, 1 }
   0x5   : > { %p186_p2 = scmp.lt.s32.totalorder %s2832_s19, 7 }
   0x6   : > { %s4854_s20 = smov (%p24_p0, %s23_s20), 0  ;;  %s4856_s21 = smov (!%p24_p0, %s26_s21), %s2828_s18 }
   0x7   : > { %p187_p3 = pnand %p2692_p1, %p186_p2  ;;  %p28_p4 = scmp.ge.s32.totalorder %s4856_s21, 3 }
   0x9   : > { %s4858_s21 = smov (%p28_p4, %s4856_s21), 0  ;;  %190 = sbr.rel (%p187_p3) target bundleno = 1244 (0x4dc), region = 36 }
   0xe   : > { %p216_p5 = scmp.eq.s32.totalorder %s2820_s16, 0  ;;  %p225_p6 = scmp.eq.s32.totalorder %s2820_s16, 2  ;;  %v2925_v0 = vld [vmem:[%s4626_s2] sm:$0xf] }
   0xf   : > { %4720 = vst [vmem:[#allocation6_spill] sm:$0xff] %v2925_v0  ;;  %p2697_p9 = scmp.ne.s32.totalorder %s2820_s16, 0 }
  0x10   : > { %s217_s24 = scalar_select %p216_p5, %s2816_s15, 0 }
  0x11   : > { %s226_s25 = scalar_select %p225_p6, %s2816_s15, 0 }
  0x12   : > { %p218_p7 = scmp.lt.s32.totalorder %s217_s24, 1 }
  0x13   : > { %p227_p8 = scmp.lt.s32.totalorder %s226_s25, 1  ;;  %238 = sbr.rel (%p2697_p9) target bundleno = 803 (0x323), region = 40 }
  0x14   : > { %s4860_s24 = smov (!%p218_p7, %s217_s24), 1 }
  0x15   : > { %s4862_s25 = smov (!%p227_p8, %s226_s25), 1  ;;  %s2713_s26 = sshll.u32 %s4860_s24, 7 }
  0x16   : > { %s2932_s29 = scalar_lea.vmem %s4625_s1, %s2713_s26  ;;  %s2714_s30 = sshll.u32 %s4862_s25, 6 }
  0x17   : > { %s2937_s7 = scalar_lea.vmem %s4628_s4, %s2714_s30 }
  0x18   : > { %p2698_p10 = scmp.ne.s32.totalorder %s2816_s15, 0 }
  0x1a   : > { %242 = sbr.rel (%p2698_p10) target bundleno = 36 (0x24), region = 44 }
  0x1f   : > { %vm243_vm0 = vcmask 7168   ;;  %vm245_vm1 = vcmask 3072   ;;  %v2834_v1 = vmov 0.0  }
  0x20   : > { %244 = vst.msk [vmem:[#allocation4] sm:$0xff] %vm243_vm0, %v2834_v1 }
  0x21   : > { %247 = vst.msk [vmem:[#allocation5] sm:$0xff] %vm243_vm0, %v2834_v1 }
  0x22   : > { %246 = vst.msk [vmem:[#allocation4 + $0x8] sm:$0xf] %vm245_vm1, %v2834_v1 }
  0x23   : > { %248 = vst.msk [vmem:[#allocation5 + $0x8] sm:$0xf] %vm245_vm1, %v2834_v1 }
  0x24 PF: > { %v2942_v2 = vld [vmem:[%s2932_s29 + $0x20] sm:$0xff]  ;;  %v2945_v3 = vld [vmem:[%s2932_s29 + $0x10] sm:$0xff]  ;;  %s2835_s8 = smov 4   ;;  %v2954_v5 = vld [vmem:[%s2932_s29 + $0x58] sm:$0xf]  ;;  %s2836_s9 = smov 1  }
  0x25   : > { %v2948_v4 = vld [vmem:[%s2932_s29] sm:$0xff]  ;;  %277 = vrot.lane.b32.xlu2 %v2942_v2, %s2835_s8  ;;  %273 = vrot.lane.b32.xlu1 %v2945_v3, %s2835_s8  ;;  %676 = vst [vmem:[#allocation2 + $0x1a0] sm:$0xf] %v2954_v5  ;;  %v2959_v7 = vld [vmem:[%s2932_s29 + $0x18] sm:$0xff]  ;;  %v2970_v10 = vrot.slane %v2945_v3, 4  ;;  %v2986_v14 = vrot.slane %v2942_v2, 4 }
  0x26   : > { %269 = vrot.lane.b32.xlu0 %v2948_v4, %s2835_s8  ;;  %v292_v6 = vrot.slane %v2948_v4, 4  ;;  %v2962_v8 = vld [vmem:[%s2932_s29 + $0x8] sm:$0xff]  ;;  %v2973_v11 = vrot.slane %v2959_v7, 4  ;;  %v2981_v13 = vld [vmem:[%s2932_s29 + $0x50] sm:$0xf]  ;;  %s4629_s10 = smov 126  }
  0x27   : > { %v257_v9 = vld [vmem:[%s2932_s29 + $0x48] sm:$0xf]  ;;  %v2976_v12 = vrot.slane %v2962_v8, 4  ;;  %675 = vst [vmem:[#allocation2 + $0xd0] sm:$0xf] %v2981_v13  ;;  %s2838_s11 = smov 78  }
  0x28   : > { %674 = vst [vmem:[#allocation2 + $0xa8] sm:$0xf] %v257_v9  ;;  %v256_v15 = vld [vmem:[%s2932_s29 + $0x40] sm:$0xf]  ;;  %v3004_v17 = vrot.slane %v2954_v5, 4  ;;  %s4633_s12 = smov 92  }
  0x29   : > { %673 = vst [vmem:[#allocation2 + $0x40] sm:$0xf] %v256_v15  ;;  %v2995_v16 = vld [vmem:[%s2932_s29 + $0x60] sm:$0xf]  ;;  %s4631_s13 = smov 85   ;;  %s2841_s14 = smov 39  }
  0x2a   : > { %v3013_v18 = vrot.slane %v2995_v16, 4  ;;  %v3021_v19 = vrot.slane %v2981_v13, 4  ;;  %v683_v20 = vrot.slane %v257_v9, 4  ;;  %s2842_s22 = smov 32   ;;  %s4635_s23 = smov 114   ;;  %v682_v21 = vrot.slane %v256_v15, 4 }
  0x2b   : > { %s2844_s24 = smov 46   ;;  %s4637_s25 = smov 121   ;;  %v3048_v23 = vld [vmem:[%s2932_s29 + $0x68] sm:$0xf]  ;;  %vm279_vm2 = vcmask 31744   ;;  %vm4647_vm3 = vcmask 7168  }
  0x2c   : > { %s2846_s26 = smov 17   ;;  %s2847_s27 = smov 12   ;;  %v3070_v29 = vrot.slane %v3048_v23, 4  ;;  %vm4648_vm4 = vcmask 1031168   ;;  %vm4654_vm5 = vcmask 637952   ;;  %vm815_vm6 = vcmask 752640  }
  0x2d   : > { %275 = vrot.lane.b32.xlu1 %v2959_v7, %s2835_s8  ;;  %297 = vrot.lane.b32.xlu2 %v292_v6, %s2836_s9  ;;  %s2848_s28 = smov 34   ;;  %s2849_s30 = smov 22   ;;  %vm941_vm7 = vcmask 1043456   ;;  %vm378_vm8 = vcmask 318464   ;;  %vm4649_vm9 = vcmask 695296   ;;  %vm790_vm10 = vcmask 261120  }
  0x2e   : > { %271 = vrot.lane.b32.xlu0 %v2962_v8, %s2835_s8  ;;  %s2850_s5 = smov 44   ;;  %s2851_s6 = smov 61   ;;  %vm4650_vm11 = vcmask 375808   ;;  %vm720_vm12 = vcmask 932864   ;;  %vm697_vm13 = vcmask 990208   ;;  %vm660_vm14 = vcmask 97280  }
  0x2f   : > { %s2852_s8 = smov 56   ;;  %vm4655_vm15 = vcmask 138240   ;;  %vm591_vm0 = vcmask 277504   ;;  %vm4656_vm1 = vcmask 179200  }
  0x35   : > { %301 = vrot.lane.b32.xlu1 %v2970_v10, %s2836_s9  ;;  %303 = vrot.lane.b32.xlu2 %v2973_v11, %s2836_s9 }
  0x36   : > { %299 = vrot.lane.b32.xlu0 %v2976_v12, %s2836_s9 }
  0x3d   : > { %321 = vrot.lane.b32.xlu1 %v2962_v8, %s4629_s10  ;;  %323 = vrot.lane.b32.xlu2 %v2945_v3, %s4629_s10 }
  0x3e   : > { %305 = vrot.lane.b32.xlu0 %v2986_v14, %s2836_s9  ;;  %s2853_s9 = smov 74  }
  0x45   : > { %853 = vrot.lane.b32.xlu1 %v2954_v5, %s2838_s11  ;;  %855 = vrot.lane.b32.xlu2 %v2995_v16, %s2838_s11 }
  0x46   : > { %325 = vrot.lane.b32.xlu0 %v2959_v7, %s4629_s10  ;;  %s2854_s10 = smov 66  }
  0x4d   : > { %807 = vrot.lane.b32.xlu1 %v2995_v16, %s4633_s12  ;;  %830 = vrot.lane.b32.xlu2 %v3004_v17, %s4631_s13 }
  0x4e   : > { %805 = vrot.lane.b32.xlu0 %v2954_v5, %s4633_s12 }
  0x55   : > { %758 = vrot.lane.b32.xlu1 %v257_v9, %s2841_s14  ;;  %760 = vrot.lane.b32.xlu2 %v2981_v13, %s2841_s14 }
  0x56   : > { %832 = vrot.lane.b32.xlu0 %v3013_v18, %s4631_s13 }
  0x5d   : > { %782 = vrot.lane.b32.xlu1 %v3021_v19, %s2842_s22  ;;  %710 = vrot.lane.b32.xlu2 %v256_v15, %s4635_s23 }
  0x5e   : > { %780 = vrot.lane.b32.xlu0 %v683_v20, %s2842_s22 }
  0x65   : > { %735 = vrot.lane.b32.xlu1 %v683_v20, %s2844_s24  ;;  %737 = vrot.lane.b32.xlu2 %v3021_v19, %s2844_s24 }
  0x66   : > { %712 = vrot.lane.b32.xlu0 %v257_v9, %s4635_s23 }
  0x6d   : > { %689 = vrot.lane.b32.xlu1 %v683_v20, %s4637_s25  ;;  %627 = vrot.lane.b32.xlu2 %v2970_v10, %s2846_s26 }
  0x6e   : > { %687 = vrot.lane.b32.xlu0 %v682_v21, %s4637_s25 }
  0x75   : > { %650 = vrot.lane.b32.xlu1 %v2945_v3, %s2847_s27  ;;  %652 = vrot.lane.b32.xlu2 %v2959_v7, %s2847_s27 }
  0x76   : > { %629 = vrot.lane.b32.xlu0 %v2973_v11, %s2846_s26 }
  0x7d   : > { %583 = vrot.lane.b32.xlu1 %v2970_v10, %s2848_s28  ;;  %604 = vrot.lane.b32.xlu2 %v2945_v3, %s2849_s30 }
  0x7e   : > { %581 = vrot.lane.b32.xlu0 %v2976_v12, %s2848_s28 }
  0x7f   : > { %v278_v22 = vpop.permute.xlu2 %277 }
  0x85   : > { %857 = vrot.lane.b32.xlu1 %v3048_v23, %s2838_s11  ;;  %368 = vrot.lane.b32.xlu2 %v2962_v8, %s2841_s14 }
  0x86   : > { %606 = vrot.lane.b32.xlu0 %v2959_v7, %s2849_s30 }
  0x87   : > { %v298_v24 = vpop.permute.xlu2 %297 }
  0x8d   : > { %554 = vrot.lane.b32.xlu1 %v2976_v12, %s2850_s5  ;;  %556 = vrot.lane.b32.xlu2 %v2970_v10, %s2850_s5 }
  0x8e   : > { %370 = vrot.lane.b32.xlu0 %v2945_v3, %s2841_s14 }
  0x8f   : > { %v304_v25 = vpop.permute.xlu2 %303 }
  0x95   : > { %510 = vrot.lane.b32.xlu1 %v2976_v12, %s2851_s6  ;;  %531 = vrot.lane.b32.xlu2 %v2948_v4, %s2852_s8 }
  0x96   : > { %508 = vrot.lane.b32.xlu0 %v292_v6, %s2851_s6 }
  0x97   : > { %v274_v26 = vpop.permute.xlu1 %273  ;;  %v324_v27 = vpop.permute.xlu2 %323 }
  0x98   : > { %v270_v28 = vpop.permute.xlu0 %269 }
  0x9d   : > { %809 = vrot.lane.b32.xlu1 %v3048_v23, %s4633_s12  ;;  %834 = vrot.lane.b32.xlu2 %v3070_v29, %s4631_s13  ;;  %s4643_s13 = smov 80   ;;  %s4645_s12 = smov 77  }
  0x9e   : > { %533 = vrot.lane.b32.xlu0 %v2962_v8, %s2852_s8 }
  0x9f   : > { %v276_v30 = vpop.permute.xlu1 %275  ;;  %v3078_v31 = vpop.permute.xlu2 %855 }
  0xa0   : > { %v282_v32 = vsel %vm279_vm2, %v274_v26, %v276_v30  ;;  %v283_v33 = vsel %vm279_vm2, %v276_v30, %v278_v22  ;;  %v272_v34 = vpop.permute.xlu0 %271 }
  0xa1   : > { %290 = vst [vmem:[#allocation2 + $0xd8] sm:$0xf] %v282_v32  ;;  %v280_v35 = vsel %vm279_vm2, %v270_v28, %v272_v34  ;;  %v281_v36 = vsel %vm279_vm2, %v272_v34, %v274_v26  ;;  %vm564_vm2 = vcmask 359424  }
  0xa2   : > { %291 = vst [vmem:[#allocation2 + $0x18] sm:$0xf] %v283_v33 }
  0xa3   : > { %288 = vst [vmem:[#allocation2 + $0xb0] sm:$0xf] %v280_v35 }
  0xa4   : > { %289 = vst [vmem:[#allocation2 + $0x1b0] sm:$0xf] %v281_v36 }
  0xa5   : > { %464 = vrot.lane.b32.xlu1 %v2959_v7, %s2853_s9  ;;  %485 = vrot.lane.b32.xlu2 %v2948_v4, %s2854_s10 }
  0xa6   : > { %462 = vrot.lane.b32.xlu0 %v2945_v3, %s2853_s9 }
  0xa7   : > { %v302_v37 = vpop.permute.xlu1 %301  ;;  %v3086_v38 = vpop.permute.xlu2 %830 }
  0xa8   : > { %v310_v39 = vsel %vm4647_vm3, %v302_v37, %v304_v25  ;;  %v300_v40 = vpop.permute.xlu0 %299 }
  0xa9   : > { %318 = vst [vmem:[#allocation2 + $0xd8] sm:$0xf0] %v310_v39  ;;  %v308_v41 = vsel %vm4647_vm3, %v298_v24, %v300_v40  ;;  %v309_v42 = vsel %vm4647_vm3, %v300_v40, %v302_v37 }
  0xaa   : > { %316 = vst [vmem:[#allocation2 + $0xb0] sm:$0xf0] %v308_v41 }
  0xab   : > { %317 = vst [vmem:[#allocation2 + $0x1b0] sm:$0xf0] %v309_v42 }
  0xad   : > { %762 = vrot.lane.b32.xlu1 %v2954_v5, %s2841_s14  ;;  %784 = vrot.lane.b32.xlu2 %v3004_v17, %s2842_s22 }
  0xae   : > { %487 = vrot.lane.b32.xlu0 %v2962_v8, %s2854_s10 }
  0xaf   : > { %v322_v43 = vpop.permute.xlu1 %321  ;;  %v3097_v44 = vpop.permute.xlu2 %760 }
  0xb0   : > { %v332_v45 = vsel %vm4648_vm4, %v322_v43, %v324_v27  ;;  %v306_v46 = vpop.permute.xlu0 %305 }
  0xb1   : > { %340 = vst [vmem:[#allocation2 + $0x50] sm:$0xf] %v332_v45  ;;  %v311_v47 = vsel %vm4647_vm3, %v304_v25, %v306_v46  ;;  %vm4657_vm3 = vcmask 498688  }
  0xb2   : > { %319 = vst [vmem:[#allocation2 + $0x18] sm:$0xf0] %v311_v47 }
  0xb5   : > { %417 = vrot.lane.b32.xlu1 %v2959_v7, %s4643_s13  ;;  %439 = vrot.lane.b32.xlu2 %v2970_v10, %s4645_s12 }
  0xb6   : > { %415 = vrot.lane.b32.xlu0 %v2945_v3, %s4643_s13 }
  0xb7   : > { %v854_v48 = vpop.permute.xlu1 %853  ;;  %v3107_v49 = vpop.permute.xlu2 %710 }
  0xb8   : > { %v864_v50 = vsel %vm4654_vm5, %v854_v48, %v3078_v31  ;;  %v3111_v51 = vpop.permute.xlu0 %325 }
  0xb9   : > { %4721 = vst [vmem:[#allocation7_spill] sm:$0xff] %v3111_v51  ;;  %v333_v52 = vsel %vm4648_vm4, %v324_v27, %v3111_v51  ;;  %vm4697_vm4 = vcmask 457728  }
  0xba   : > { %872 = vst [vmem:[#allocation2 + $0x58] sm:$0xf] %v864_v50 }
  0xbb   : > { %341 = vst [vmem:[#allocation2 + $0x168] sm:$0xf] %v333_v52 }
  0xbd   : > { %714 = vrot.lane.b32.xlu1 %v2981_v13, %s4635_s23  ;;  %739 = vrot.lane.b32.xlu2 %v3004_v17, %s2844_s24  ;;  %s4639_s23 = smov 36  }
  0xbe   : > { %441 = vrot.lane.b32.xlu0 %v2973_v11, %s4645_s12 }
  0xbf   : > { %v3121_v53 = vpop.permute.xlu1 %807  ;;  %v3123_v54 = vpop.permute.xlu2 %737 }
  0xc0   : > { %v806_v55 = vpop.permute.xlu0 %805 }
  0xc1   : > { %v930_v56 = vld [vmem:[#allocation2 + $0x58] sm:$0xf]  ;;  %v816_v57 = vsel %vm815_vm6, %v806_v55, %v3121_v53 }
  0xc2   : > { %v943_v58 = vsel %vm941_vm7, %v930_v56, 0  ;;  %824 = vst [vmem:[#allocation2 + $0x128] sm:$0xf] %v816_v57 }
  0xc3   : > { %v3128_v59 = vand.u32 4294901760, %v943_v58 }
  0xc5   : > { %957 = vmatpush.msra.mxu0 %v3128_v59  ;;  %1154 = vmatpush.msra.mxu3 %v3128_v59  ;;  %v3133_v60 = vsub.f32 %v943_v58, %v3128_v59 }
  0xc6   : > { %393 = vrot.lane.b32.xlu1 %v2970_v10, %s4639_s23  ;;  %691 = vrot.lane.b32.xlu2 %v3021_v19, %s4637_s25  ;;  %s4641_s25 = smov 42  }
  0xc7   : > { %391 = vrot.lane.b32.xlu0 %v2976_v12, %s4639_s23  ;;  %1100 = vmatpush.msra.mxu2 %v3133_v60  ;;  %v4664_v61 = vand.u32 4294901760, %v3133_v60  ;;  %v759_v62 = vpop.permute.xlu1 %758  ;;  %v3143_v63 = vpop.permute.xlu2 %627 }
  0xc8   : > { %v768_v1 = vsel %vm378_vm8, %v759_v62, %v3097_v44  ;;  %v3147_v4 = vpop.permute.xlu0 %832 }
  0xc9   : > { %v1006_v6 = vsub.f32 %v3133_v60, %v4664_v61  ;;  %776 = vst [vmem:[#allocation2 + $0x70] sm:$0xf] %v768_v1  ;;  %v841_v8 = vsel %vm4649_vm9, %v3086_v38, %v3147_v4 }
  0xca   : > { %849 = vst [vmem:[#allocation2 + $0x128] sm:$0xf0] %v841_v8 }
  0xcb   : > { %v1007_v9 = vand.u32 4294901760, %v1006_v6 }
  0xcd   : > { %1008 = vmatpush.msra.mxu1 %v1007_v9 }
  0xce   : > { %347 = vrot.lane.b32.xlu1 %v2970_v10, %s4641_s25  ;;  %631 = vrot.lane.b32.xlu2 %v2986_v14, %s2846_s26 }
  0xcf   : > { %345 = vrot.lane.b32.xlu0 %v2976_v12, %s4641_s25  ;;  %v3161_v13 = vpop.permute.xlu1 %782  ;;  %v3163_v15 = vpop.permute.xlu2 %652 }
  0xd0   : > { %v781_v19 = vpop.permute.xlu0 %780 }
  0xd1   : > { %v791_v20 = vsel %vm790_vm10, %v781_v19, %v3161_v13  ;;  %v926_v21 = vld [vmem:[#allocation2 + $0x128] sm:$0xff] }
  0xd2   : > { %799 = vst [vmem:[#allocation2 + $0x70] sm:$0xf0] %v791_v20  ;;  %v3167_v22 = vand.u32 4294901760, %v926_v21 }
  0xd4   : > { %959 = vmatpush.msra.mxu0 %v3167_v22  ;;  %1156 = vmatpush.msra.mxu3 %v3167_v22  ;;  %v3172_v24 = vsub.f32 %v926_v21, %v3167_v22 }
  0xd6   : > { %585 = vrot.lane.b32.xlu1 %v2973_v11, %s2848_s28  ;;  %608 = vrot.lane.b32.xlu2 %v2942_v2, %s2849_s30  ;;  %v4663_v12 = vand.u32 4294901760, %v3172_v24 }
  0xd7   : > { %654 = vrot.lane.b32.xlu0 %v2942_v2, %s2847_s27  ;;  %1103 = vmatpush.msra.mxu2 %v3172_v24  ;;  %v736_v25 = vpop.permute.xlu1 %735  ;;  %v3182_v26 = vpop.permute.xlu2 %604 }
  0xd8   : > { %v746_v27 = vsel %vm4650_vm11, %v736_v25, %v3123_v54  ;;  %v3186_v28 = vpop.permute.xlu0 %712  ;;  %v1012_v30 = vsub.f32 %v3172_v24, %v4663_v12 }
  0xd9   : > { %754 = vst [vmem:[#allocation2 + $0x10] sm:$0xf0] %v746_v27  ;;  %v721_v32 = vsel %vm720_vm12, %v3107_v49, %v3186_v28  ;;  %v922_v33 = vld [vmem:[#allocation2 + $0x70] sm:$0xff] }
  0xda   : > { %729 = vst [vmem:[#allocation2 + $0x10] sm:$0xf] %v721_v32  ;;  %v3194_v34 = vand.u32 4294901760, %v922_v33  ;;  %v1013_v35 = vand.u32 4294901760, %v1012_v30  ;;  %v262_v27 = vld [vmem:[%s2932_s29 + $0x70] sm:$0xf] }
  0xdc   : > { %961 = vmatpush.msra.mxu0 %v3194_v34  ;;  %1014 = vmatpush.msra.mxu1 %v1013_v35  ;;  %v3198_v36 = vsub.f32 %v922_v33, %v3194_v34 }
  0xdd   : > { %1158 = vmatpush.msra.mxu3 %v3194_v34 }
  0xde   : > { %558 = vrot.lane.b32.xlu1 %v2973_v11, %s2850_s5  ;;  %512 = vrot.lane.b32.xlu2 %v2970_v10, %s2851_s6  ;;  %v4662_v37 = vand.u32 4294901760, %v3198_v36 }
  0xdf   : > { %372 = vrot.lane.b32.xlu0 %v2959_v7, %s2841_s14  ;;  %1106 = vmatpush.msra.mxu2 %v3198_v36  ;;  %v3209_v38 = vpop.permute.xlu1 %689  ;;  %v3211_v39 = vpop.permute.xlu2 %368 }
  0xe0   : > { %v688_v40 = vpop.permute.xlu0 %687  ;;  %v1018_v41 = vsub.f32 %v3198_v36, %v4662_v37 }
  0xe1   : > { %v698_v42 = vsel %vm697_vm13, %v688_v40, %v3209_v38  ;;  %v918_v43 = vld [vmem:[#allocation2 + $0x10] sm:$0xff] }
  0xe2   : > { %706 = vst [vmem:[#allocation2 + $0x40] sm:$0xf0] %v698_v42  ;;  %v3218_v10 = vand.u32 4294901760, %v918_v43  ;;  %v1019_v45 = vand.u32 4294901760, %v1018_v41 }
  0xe4   : > { %963 = vmatpush.msra.mxu0 %v3218_v10  ;;  %1020 = vmatpush.msra.mxu1 %v1019_v45  ;;  %v3222_v46 = vsub.f32 %v918_v43, %v3218_v10 }
  0xe5   : > { %1160 = vmatpush.msra.mxu3 %v3218_v10 }
  0xe6   : > { %466 = vrot.lane.b32.xlu1 %v2942_v2, %s2853_s9  ;;  %489 = vrot.lane.b32.xlu2 %v2945_v3, %s2854_s10  ;;  %v4661_v47 = vand.u32 4294901760, %v3222_v46 }
  0xe7   : > { %535 = vrot.lane.b32.xlu0 %v2945_v3, %s2852_s8  ;;  %1109 = vmatpush.msra.mxu2 %v3222_v46  ;;  %v651_v48 = vpop.permute.xlu1 %650  ;;  %v3233_v49 = vpop.permute.xlu2 %556 }
  0xe8   : > { %v661_v50 = vsel %vm660_vm14, %v651_v48, %v3163_v15  ;;  %v3237_v52 = vpop.permute.xlu0 %629  ;;  %v1024_v55 = vsub.f32 %v3222_v46, %v4661_v47 }
  0xe9   : > { %669 = vst [vmem:[#allocation2] sm:$0xf0] %v661_v50  ;;  %v638_v3 = vsel %vm4655_vm15, %v3143_v63, %v3237_v52  ;;  %v914_v56 = vld [vmem:[#allocation2 + $0x40] sm:$0xff]  ;;  %v828_v50 = vrot.slane %v262_v27, 4 }
  0xea   : > { %646 = vst [vmem:[#allocation2] sm:$0xf] %v638_v3  ;;  %v3245_v57 = vand.u32 4294901760, %v914_v56  ;;  %v1025_v58 = vand.u32 4294901760, %v1024_v55 }
  0xec   : > { %965 = vmatpush.msra.mxu0 %v3245_v57  ;;  %1026 = vmatpush.msra.mxu1 %v1025_v58  ;;  %v3249_v62 = vsub.f32 %v914_v56, %v3245_v57 }
  0xed   : > { %1162 = vmatpush.msra.mxu3 %v3245_v57 }
  0xee   : > { %443 = vrot.lane.b32.xlu1 %v2986_v14, %s4645_s12  ;;  %395 = vrot.lane.b32.xlu2 %v2973_v11, %s4639_s23  ;;  %v4660_v63 = vand.u32 4294901760, %v3249_v62  ;;  %s4722_s23 = smov 92   ;;  %s4726_s12 = smov 121  }
  0xef   : > { %419 = vrot.lane.b32.xlu0 %v2942_v2, %s4643_s13  ;;  %1112 = vmatpush.msra.mxu2 %v3249_v62  ;;  %v3260_v1 = vpop.permute.xlu1 %583  ;;  %v3262_v6 = vpop.permute.xlu2 %531  ;;  %s4725_s13 = smov 114  }
  0xf0   : > { %v582_v8 = vpop.permute.xlu0 %581  ;;  %v1030_v9 = vsub.f32 %v3249_v62, %v4660_v63 }
  0xf1   : > { %v592_v19 = vsel %vm591_vm0, %v582_v8, %v3260_v1  ;;  %v910_v20 = vld [vmem:[#allocation2] sm:$0xff] }
  0xf2   : > { %600 = vst [vmem:[#allocation2 + $0x90] sm:$0xf] %v592_v19  ;;  %v3269_v21 = vand.u32 4294901760, %v910_v20  ;;  %v1031_v25 = vand.u32 4294901760, %v1030_v9 }
  0xf4   : > { %967 = vmatpush.msra.mxu0 %v3269_v21  ;;  %1032 = vmatpush.msra.mxu1 %v1031_v25  ;;  %v3274_v30 = vsub.f32 %v910_v20, %v3269_v21  ;;  %v3335_v20 = vld [vmem:[%s2932_s29 + $0x28] sm:$0xff] }
  0xf5   : > { %1164 = vmatpush.msra.mxu3 %v3269_v21 }
  0xf6   : > { %859 = vrot.lane.b32.xlu1 %v262_v27, %s2838_s11  ;;  %811 = vrot.lane.b32.xlu2 %v262_v27, %s4722_s23  ;;  %v4653_v32 = vand.u32 4294901760, %v3274_v30 }
  0xf7   : > { %349 = vrot.lane.b32.xlu0 %v2973_v11, %s4641_s25  ;;  %1115 = vmatpush.msra.mxu2 %v3274_v30  ;;  %v3283_v33 = vpop.permute.xlu1 %857  ;;  %v3285_v35 = vpop.permute.xlu2 %834  ;;  %s4724_s25 = smov 85  }
  0xf8   : > { %4723 = vst [vmem:[#allocation8_spill] sm:$0xff] %v3285_v35  ;;  %v865_v40 = vsel %vm4654_vm5, %v3078_v31, %v3283_v33  ;;  %v3290_v41 = vpop.permute.xlu0 %606  ;;  %v842_v42 = vsel %vm4649_vm9, %v3147_v4, %v3285_v35  ;;  %v1036_v43 = vsub.f32 %v3274_v30, %v4653_v32  ;;  %vm472_vm9 = vcmask 605184  }
  0xf9   : > { %873 = vst [vmem:[#allocation2 + $0xf0] sm:$0xf] %v865_v40  ;;  %v615_v45 = vsel %vm4656_vm1, %v3182_v26, %v3290_v41  ;;  %vm425_vm5 = vcmask 654336  }
  0xfa   : > { %623 = vst [vmem:[#allocation2 + $0x90] sm:$0xf0] %v615_v45  ;;  %v1037_v48 = vand.u32 4294901760, %v1036_v43  ;;  %v3346_v43 = vrot.slane %v3335_v20, 4 }
  0xfb   : > { %850 = vst [vmem:[#allocation2 + $0x38] sm:$0xf0] %v842_v42 }
  0xfc   : > { %1038 = vmatpush.msra.mxu1 %v1037_v48 }
  0xfe   : > { %764 = vrot.lane.b32.xlu1 %v2995_v16, %s2841_s14  ;;  %786 = vrot.lane.b32.xlu2 %v3013_v18, %s2842_s22 }
  0xff   : > { %836 = vrot.lane.b32.xlu0 %v828_v50, %s4724_s25  ;;  %v555_v31 = vpop.permute.xlu1 %554  ;;  %v3306_v4 = vpop.permute.xlu2 %485 }
 0x100   : > { %v565_v26 = vsel %vm564_vm2, %v555_v31, %v3233_v49  ;;  %v3310_v55 = vpop.permute.xlu0 %370 }
 0x101   : > { %573 = vst [vmem:[#allocation2 + $0xe8] sm:$0xf] %v565_v26  ;;  %v379_v3 = vsel %vm378_vm8, %v3211_v39, %v3310_v55  ;;  %v906_v56 = vld [vmem:[#allocation2 + $0x90] sm:$0xff] }
 0x102   : > { %387 = vst [vmem:[#allocation2 + $0x180] sm:$0xf] %v379_v3  ;;  %v3315_v58 = vand.u32 4294901760, %v906_v56 }
 0x103   : > { %577 = vst [vmem:[#allocation2 + $0xe8] sm:$0xf0] %v379_v3 }
 0x104   : > { %969 = vmatpush.msra.mxu0 %v3315_v58  ;;  %1166 = vmatpush.msra.mxu3 %v3315_v58  ;;  %v3320_v8 = vsub.f32 %v906_v56, %v3315_v58 }
 0x106   : > { %741 = vrot.lane.b32.xlu1 %v3013_v18, %s2844_s24  ;;  %693 = vrot.lane.b32.xlu2 %v3004_v17, %s4726_s12  ;;  %v4652_v39 = vand.u32 4294901760, %v3320_v8 }
 0x107   : > { %716 = vrot.lane.b32.xlu0 %v2954_v5, %s4725_s13  ;;  %1118 = vmatpush.msra.mxu2 %v3320_v8  ;;  %v3330_v9 = vpop.permute.xlu1 %510  ;;  %v3332_v19 = vpop.permute.xlu2 %784 }
 0x108   : > { %v509_v25 = vpop.permute.xlu0 %508  ;;  %v792_v27 = vsel %vm790_vm10, %v3161_v13, %v3332_v19  ;;  %v1042_v5 = vsub.f32 %v3320_v8, %v4652_v39 }
 0x109   : > { %v519_v17 = vsel %vm4657_vm3, %v509_v25, %v3330_v9  ;;  %800 = vst [vmem:[#allocation2 + $0x78] sm:$0xf0] %v792_v27 }
 0x10a   : > { %527 = vst [vmem:[#allocation2 + $0x80] sm:$0xf] %v519_v17  ;;  %v902_v40 = vld [vmem:[#allocation2 + $0xe8] sm:$0xff]  ;;  %v1043_v42 = vand.u32 4294901760, %v1042_v5  ;;  %v263_v5 = vld [vmem:[%s2932_s29 + $0x78] sm:$0xf] }
 0x10b   : > { %v3348_v45 = vand.u32 4294901760, %v902_v40  ;;  %v829_v32 = vrot.slane %v263_v5, 4 }
 0x10c   : > { %1044 = vmatpush.msra.mxu1 %v1043_v42 }
 0x10d   : > { %971 = vmatpush.msra.mxu0 %v3348_v45  ;;  %1168 = vmatpush.msra.mxu3 %v3348_v45  ;;  %v3353_v13 = vsub.f32 %v902_v40, %v3348_v45 }
 0x10e   : > { %656 = vrot.lane.b32.xlu1 %v3335_v20, %s2847_s27  ;;  %587 = vrot.lane.b32.xlu2 %v2986_v14, %s2848_s28 }
 0x10f   : > { %633 = vrot.lane.b32.xlu0 %v3346_v43, %s2846_s26  ;;  %1121 = vmatpush.msra.mxu2 %v3353_v13  ;;  %v3362_v48 = vpop.permute.xlu1 %809  ;;  %v3364_v50 = vpop.permute.xlu2 %439  ;;  %v4651_v31 = vand.u32 4294901760, %v3353_v13 }
 0x110   : > { %v817_v26 = vsel %vm815_vm6, %v3121_v53, %v3362_v48  ;;  %v3370_v3 = vpop.permute.xlu0 %533 }
 0x111   : > { %825 = vst [vmem:[#allocation2 + $0x38] sm:$0xf] %v817_v26  ;;  %v542_v56 = vsel %vm4697_vm4, %v3262_v6, %v3370_v3  ;;  %v1048_v25 = vsub.f32 %v3353_v13, %v4651_v31 }
 0x112   : > { %550 = vst [vmem:[#allocation2 + $0x80] sm:$0xf0] %v542_v56 }
 0x113   : > { %v1049_v27 = vand.u32 4294901760, %v1048_v25 }
 0x115   : > { %1050 = vmatpush.msra.mxu1 %v1049_v27 }
 0x116   : > { %861 = vrot.lane.b32.xlu1 %v263_v5, %s2838_s11  ;;  %374 = vrot.lane.b32.xlu2 %v2942_v2, %s2841_s14  ;;  %s4733_s11 = smov 77  }
 0x117   : > { %610 = vrot.lane.b32.xlu0 %v3335_v20, %s2849_s30  ;;  %v3384_v53 = vpop.permute.xlu1 %464  ;;  %v3386_v6 = vpop.permute.xlu2 %739 }
 0x118   : > { %4727 = vst [vmem:[#allocation9_spill] sm:$0xff] %v3386_v6  ;;  %v463_v17 = vpop.permute.xlu0 %462  ;;  %v747_v40 = vsel %vm4650_vm11, %v3123_v54, %v3386_v6  ;;  %vm4670_vm11 = vcmask 539648  }
 0x119   : > { %v473_v42 = vsel %vm472_vm9, %v463_v17, %v3384_v53  ;;  %755 = vst [vmem:[#allocation2 + $0x100] sm:$0xf0] %v747_v40  ;;  %v898_v26 = vld [vmem:[#allocation2 + $0x80] sm:$0xff] }
 0x11a   : > { %481 = vst [vmem:[#allocation2 + $0xe0] sm:$0xf] %v473_v42  ;;  %v3393_v56 = vand.u32 4294901760, %v898_v26 }
 0x11c   : > { %973 = vmatpush.msra.mxu0 %v3393_v56  ;;  %1170 = vmatpush.msra.mxu3 %v3393_v56  ;;  %v3398_v25 = vsub.f32 %v898_v26, %v3393_v56 }
 0x11e   : > { %514 = vrot.lane.b32.xlu1 %v2973_v11, %s2851_s6  ;;  %v4659_v54 = vand.u32 4294901760, %v3398_v25  ;;  %537 = vrot.lane.b32.xlu2 %v2959_v7, %s2852_s8 }
 0x11f   : > { %560 = vrot.lane.b32.xlu0 %v2986_v14, %s2850_s5  ;;  %1124 = vmatpush.msra.mxu2 %v3398_v25  ;;  %v3408_v27 = vpop.permute.xlu1 %762 }
 0x120   : > { %4728 = vst [vmem:[#allocation10_spill] sm:$0xff] %v3408_v27  ;;  %v3410_v17 = vpop.permute.xlu2 %691  ;;  %v769_v40 = vsel %vm378_vm8, %v3097_v44, %v3408_v27  ;;  %v3415_v11 = vpop.permute.xlu0 %487  ;;  %v1054_v26 = vsub.f32 %v3398_v25, %v4659_v54  ;;  %v3513_v54 = vld [vmem:[%s2932_s29 + $0x30] sm:$0xff] }
 0x121   : > { %v699_v42 = vsel %vm697_vm13, %v3209_v38, %v3410_v17  ;;  %777 = vst [vmem:[#allocation2 + $0x78] sm:$0xf] %v769_v40  ;;  %v496_v31 = vsel %vm4670_vm11, %v3306_v4, %v3415_v11 }
 0x122   : > { %504 = vst [vmem:[#allocation2 + $0xe0] sm:$0xf0] %v496_v31  ;;  %v1055_v39 = vand.u32 4294901760, %v1054_v26 }
 0x123   : > { %707 = vst [vmem:[#allocation2 + $0xa8] sm:$0xf0] %v699_v42 }
 0x124   : > { %1056 = vmatpush.msra.mxu1 %v1055_v39 }
 0x126   : > { %838 = vrot.lane.b32.xlu1 %v829_v32, %s4724_s25  ;;  %468 = vrot.lane.b32.xlu2 %v3335_v20, %s2853_s9  ;;  %s4741_s25 = smov 126  }
 0x127   : > { %813 = vrot.lane.b32.xlu0 %v263_v5, %s4722_s23  ;;  %v3430_v44 = vpop.permute.xlu1 %417 }
 0x128   : > { %v3432_v38 = vpop.permute.xlu2 %631  ;;  %v416_v40 = vpop.permute.xlu0 %415  ;;  %v923_v37 = vld [vmem:[#allocation2 + $0x78] sm:$0xff] }
 0x129   : > { %4729 = vst [vmem:[#allocation11_spill] sm:$0xff] %v3432_v38  ;;  %v639_v4 = vsel %vm4655_vm15, %v3237_v52, %v3432_v38  ;;  %v426_v39 = vsel %vm425_vm5, %v416_v40, %v3430_v44  ;;  %v894_v32 = vld [vmem:[#allocation2 + $0xe0] sm:$0xff]  ;;  %vm449_vm15 = vcmask 629760  }
 0x12a   : > { %647 = vst [vmem:[#allocation2 + $0x68] sm:$0xf] %v639_v4  ;;  %v3439_v31 = vand.u32 4294901760, %v894_v32 }
 0x12b   : > { %434 = vst [vmem:[#allocation2 + $0x120] sm:$0xf] %v426_v39 }
 0x12c   : > { %4730 = vst [vmem:[#allocation12_spill] sm:$0xff] %v3439_v31  ;;  %975 = vmatpush.msra.mxu0 %v3439_v31  ;;  %1172 = vmatpush.msra.mxu3 %v3439_v31  ;;  %v3444_v5 = vsub.f32 %v894_v32, %v3439_v31 }
 0x12e   : > { %766 = vrot.lane.b32.xlu1 %v3048_v23, %s2841_s14  ;;  %v4658_v52 = vand.u32 4294901760, %v3444_v5  ;;  %788 = vrot.lane.b32.xlu2 %v3070_v29, %s2842_s22  ;;  %s4734_s22 = smov 80  }
 0x12f   : > { %491 = vrot.lane.b32.xlu0 %v2959_v7, %s2854_s10  ;;  %1127 = vmatpush.msra.mxu2 %v3444_v5  ;;  %v3454_v42 = vpop.permute.xlu1 %714 }
 0x130   : > { %4731 = vst [vmem:[#allocation13_spill] sm:$0xff] %v3454_v42  ;;  %v3456_v26 = vpop.permute.xlu2 %608  ;;  %v722_v40 = vsel %vm720_vm12, %v3186_v28, %v3454_v42  ;;  %v3461_v23 = vpop.permute.xlu0 %441  ;;  %v1060_v4 = vsub.f32 %v3444_v5, %v4658_v52 }
 0x131   : > { %4732 = vst [vmem:[#allocation14_spill] sm:$0xff] %v3456_v26  ;;  %v616_v7 = vsel %vm4656_vm1, %v3290_v41, %v3456_v26  ;;  %v450_v39 = vsel %vm449_vm15, %v3364_v50, %v3461_v23  ;;  %vm401_vm1 = vcmask 293888  }
 0x132   : > { %730 = vst [vmem:[#allocation2 + $0x100] sm:$0xf] %v722_v40  ;;  %v1061_v32 = vand.u32 4294901760, %v1060_v4 }
 0x133   : > { %458 = vst [vmem:[#allocation2 + $0x120] sm:$0xf0] %v450_v39  ;;  %v931_v39 = vld [vmem:[#allocation2 + $0xf0] sm:$0xf] }
 0x134   : > { %624 = vst [vmem:[#allocation2 + $0xc0] sm:$0xf0] %v616_v7  ;;  %1062 = vmatpush.msra.mxu1 %v1061_v32 }
 0x136   : > { %445 = vrot.lane.b32.xlu1 %v3346_v43, %s4733_s11  ;;  %718 = vrot.lane.b32.xlu2 %v2995_v16, %s4725_s13  ;;  %s4737_s13 = smov 36  }
 0x137   : > { %421 = vrot.lane.b32.xlu0 %v3335_v20, %s4734_s22 }
 0x138   : > { %v3478_v28 = vpop.permute.xlu1 %393  ;;  %v3480_v40 = vpop.permute.xlu2 %512 }
 0x139   : > { %v392_v41 = vpop.permute.xlu0 %391  ;;  %4735 = vst [vmem:[#allocation15_spill] sm:$0xff] %v3480_v40  ;;  %v520_v7 = vsel %vm4657_vm3, %v3330_v9, %v3480_v40  ;;  %vm355_vm3 = vcmask 343040   ;;  %v919_v40 = vld [vmem:[#allocation2 + $0x100] sm:$0xff] }
 0x13a   : > { %v402_v50 = vsel %vm401_vm1, %v392_v41, %v3478_v28  ;;  %v890_v4 = vld [vmem:[#allocation2 + $0x120] sm:$0xff]  ;;  %528 = vst [vmem:[#allocation2 + $0x1a8] sm:$0xf] %v520_v7  ;;  %v946_v41 = vsel %vm941_vm7, %v931_v39, 0 }
 0x13b   : > { %410 = vst [vmem:[#allocation2 + $0x180] sm:$0xf0] %v402_v50  ;;  %v3487_v32 = vand.u32 4294901760, %v890_v4  ;;  %v3505_v7 = vand.u32 4294901760, %v946_v41 }
 0x13d   : > { %4736 = vst [vmem:[#allocation16_spill] sm:$0xff] %v3487_v32  ;;  %977 = vmatpush.msra.mxu0 %v3487_v32  ;;  %1174 = vmatpush.msra.mxu3 %v3487_v32  ;;  %v3492_v16 = vsub.f32 %v890_v4, %v3487_v32  ;;  %v927_v4 = vld [vmem:[#allocation2 + $0x38] sm:$0xff]  ;;  %v3526_v51 = vsub.f32 %v946_v41, %v3505_v7 }
 0x13e   : > { %397 = vrot.lane.b32.xlu1 %v2986_v14, %s4737_s13  ;;  %695 = vrot.lane.b32.xlu2 %v3013_v18, %s4726_s12  ;;  %v3522_v0 = vand.u32 4294901760, %v927_v4 }
 0x13f   : > { %743 = vrot.lane.b32.xlu0 %v3070_v29, %s2844_s24  ;;  %v4667_v9 = vand.u32 4294901760, %v3492_v16  ;;  %1130 = vmatpush.msra.mxu2 %v3492_v16  ;;  %s4740_s24 = smov 42  }
 0x140   : > { %v3503_v50 = vpop.permute.xlu1 %347  ;;  %v3507_v52 = vpop.permute.xlu2 %489 }
 0x141   : > { %v346_v39 = vpop.permute.xlu0 %345  ;;  %4738 = vst [vmem:[#allocation17_spill] sm:$0xff] %v3507_v52  ;;  %v1066_v29 = vsub.f32 %v3492_v16, %v4667_v9  ;;  %v497_v18 = vsel %vm4670_vm11, %v3415_v11, %v3507_v52  ;;  %vm934_vm11 = vcmask 883712   ;;  %v878_v11 = vld [vmem:[#allocation2 + $0xb0] sm:$0xff]  ;;  %v3549_v9 = vand.u32 4294901760, %v919_v40  ;;  %v915_v52 = vld [vmem:[#allocation2 + $0xa8] sm:$0xff] }
 0x142   : > { %v356_v63 = vsel %vm355_vm3, %v346_v39, %v3503_v50  ;;  %v886_v47 = vld [vmem:[#allocation2 + $0x180] sm:$0xff]  ;;  %505 = vst [vmem:[#allocation2 + $0x188] sm:$0xf0] %v497_v18  ;;  %v3557_v38 = vand.u32 4294901760, %v878_v11  ;;  %v3582_v27 = vand.u32 4294901760, %v915_v52 }
 0x143   : > { %364 = vst [vmem:[#allocation2 + $0x50] sm:$0xf0] %v356_v63  ;;  %v3520_v12 = vand.u32 4294901760, %v886_v47  ;;  %v1067_v61 = vand.u32 4294901760, %v1066_v29  ;;  %v876_v39 = vld [vmem:[%s4624_s0] sm:$0xff]  ;;  %v3535_v29 = vand.u32 4294901760, %v923_v37  ;;  %v3591_v31 = vsub.f32 %v919_v40, %v3549_v9 }
 0x144   : > { %v936_v18 = vsel %vm934_vm11, %v876_v39, 0  ;;  %v4742_v39 = vrot.slane %v3513_v54, 4  ;;  %4743 = vst [vmem:[#allocation19_spill] sm:$0xff] %v3557_v38 }
 0x145   : > { %4739 = vst [vmem:[#allocation18_spill] sm:$0xff] %v3520_v12  ;;  %979 = vmatpush.msra.mxu0 %v3520_v12  ;;  %1068 = vmatpush.msra.mxu1 %v1067_v61  ;;  %v3533_v63 = vsub.f32 %v886_v47, %v3520_v12  ;;  %v3539_v41 = vand.u32 4294901760, %v936_v18  ;;  %v3547_v47 = vsub.f32 %v927_v4, %v3522_v0 }
 0x146   : > { %1176 = vmatpush.msra.mxu3 %v3520_v12  ;;  %351 = vrot.lane.b32.xlu1 %v2986_v14, %s4740_s24  ;;  %v3574_v12 = vsub.f32 %v923_v37, %v3535_v29 }
 0x147   : > { %327 = vrot.lane.b32.xlu0 %v2942_v2, %s4741_s25  ;;  %635 = vrot.lane.b32.xlu2 %v4742_v39, %s2846_s26  ;;  %v3561_v61 = vsub.f32 %v936_v18, %v3539_v41  ;;  %v4747_v39 = vand.u32 4294901760, %v3533_v63 }
 0x148   : > { %1133 = vmatpush.msra.mxu2 %v3533_v63  ;;  %v3555_v26 = vpop.permute.xlu1 %585  ;;  %v3568_v6 = vpop.permute.xlu2 %395  ;;  %4748 = vst [vmem:[#allocation23_spill] sm:$0xff] %v3574_v12 }
 0x149   : > { %4744 = vst [vmem:[#allocation20_spill] sm:$0xff] %v3561_v61  ;;  %v593_v4 = vsel %vm591_vm0, %v3260_v1, %v3555_v26  ;;  %v3566_v42 = vpop.permute.xlu0 %654  ;;  %v1072_v35 = vsub.f32 %v3533_v63, %v4747_v39  ;;  %v403_v1 = vsel %vm401_vm1, %v3478_v28, %v3568_v6  ;;  %v3585_v32 = vand.u32 4294901760, %v3561_v61 }
 0x14a   : > { %4745 = vst [vmem:[#allocation21_spill] sm:$0xff] %v3566_v42  ;;  %v662_v18 = vsel %vm660_vm14, %v3163_v15, %v3566_v42  ;;  %v882_v2 = vld [vmem:[#allocation2 + $0x50] sm:$0xff]  ;;  %v4751_v15 = vand.u32 4294901760, %v3526_v51 }
 0x14b   : > { %4746 = vst [vmem:[#allocation22_spill] sm:$0xff] %v3568_v6  ;;  %v3587_v39 = vand.u32 4294901760, %v882_v2  ;;  %v1073_v37 = vand.u32 4294901760, %v1072_v35  ;;  %v3597_v6 = vsub.f32 %v878_v11, %v3557_v38  ;;  %v987_v42 = vsub.f32 %v3561_v61, %v3585_v32 }
 0x14c   : > { %601 = vst [vmem:[#allocation2 + $0xc0] sm:$0xf] %v593_v4  ;;  %v4683_v4 = vand.u32 4294901760, %v3547_v47  ;;  %v1352_v28 = vsub.f32 %v3526_v51, %v4751_v15  ;;  %v4755_v61 = vand.u32 4294901760, %v3133_v60 }
 0x14d   : > { %4749 = vst [vmem:[#allocation24_spill] sm:$0xff] %v3585_v32  ;;  %981 = vmatpush.msra.mxu0 %v3587_v39  ;;  %1074 = vmatpush.msra.mxu1 %v1073_v37  ;;  %v3603_v35 = vsub.f32 %v882_v2, %v3587_v39  ;;  %v3619_v37 = vand.u32 4294901760, %v987_v42  ;;  %v4753_v2 = vand.u32 4294901760, %v3574_v12 }
 0x14e   : > { %670 = vst [vmem:[#allocation2 + $0x68] sm:$0xf0] %v662_v18  ;;  %1178 = vmatpush.msra.mxu3 %v3587_v39  ;;  %v3608_v18 = vsub.f32 %v915_v52, %v3582_v27  ;;  %589 = vrot.lane.b32.xlu1 %v3346_v43, %s2848_s28  ;;  %v1358_v11 = vsub.f32 %v3547_v47, %v4683_v4  ;;  %v1353_v52 = vand.u32 4294901760, %v1352_v28 }
 0x14f   : > { %4750 = vst [vmem:[#allocation25_spill] sm:$0xff] %v3587_v39  ;;  %658 = vrot.lane.b32.xlu0 %v3513_v54, %s2847_s27  ;;  %612 = vrot.lane.b32.xlu2 %v3513_v54, %s2849_s30  ;;  %v1364_v28 = vsub.f32 %v3574_v12, %v4753_v2  ;;  %v4754_v32 = vand.u32 4294901760, %v3603_v35 }
 0x150   : > { %411 = vst [vmem:[#allocation2 + $0x110] sm:$0xf0] %v403_v1  ;;  %983 = vmatpush.msra.mxu0 %v3557_v38  ;;  %v3624_v15 = vpop.permute.xlu1 %558  ;;  %1136 = vmatpush.msra.mxu2 %v3603_v35  ;;  %v3634_v1 = vpop.permute.xlu2 %811  ;;  %v1359_v60 = vand.u32 4294901760, %v1358_v11 }
 0x151   : > { %4752 = vst [vmem:[#allocation26_spill] sm:$0xff] %v3624_v15  ;;  %1180 = vmatpush.msra.mxu3 %v3557_v38  ;;  %v566_v4 = vsel %vm564_vm2, %v3233_v49, %v3624_v15  ;;  %v3632_v42 = vpop.permute.xlu0 %372  ;;  %v1078_v40 = vsub.f32 %v3603_v35, %v4754_v32  ;;  %v818_v15 = vsel %vm815_vm6, %v3362_v48, %v3634_v1  ;;  %v4758_v48 = vand.u32 4294901760, %v3597_v6 }
 0x152   : > { %1199 = vmatpush.msrb.mxu0 %v4755_v61  ;;  %574 = vst [vmem:[#allocation2 + $0xf8] sm:$0xf] %v566_v4  ;;  %v380_v49 = vsel %vm378_vm8, %v3310_v55, %v3632_v42  ;;  %1139 = vmatpush.msra.mxu2 %v3597_v6  ;;  %v4756_v61 = vand.u32 4294901760, %v3591_v31  ;;  %v4757_v55 = vand.u32 4294901760, %v3172_v24  ;;  %v4760_v24 = vand.u32 4294901760, %v3608_v18 }
 0x153   : > { %v907_v39 = vld [vmem:[#allocation2 + $0xc0] sm:$0xff]  ;;  %1354 = vmatpush.msrb.mxu3 %v1353_v52  ;;  %388 = vst [vmem:[#allocation2 + $0x110] sm:$0xf] %v380_v49  ;;  %v1079_v32 = vand.u32 4294901760, %v1078_v40  ;;  %989 = vmatmul.f32.vlgmr.msra.gmra.mxu0 %v3619_v37  ;;  %v1084_v2 = vsub.f32 %v3597_v6, %v4758_v48  ;;  %v1365_v40 = vand.u32 4294901760, %v1364_v28  ;;  %v4761_v28 = vand.u32 4294901760, %v3222_v46 }
 0x154   : > { %v3651_v12 = vand.u32 4294901760, %v907_v39  ;;  %v1370_v4 = vsub.f32 %v3591_v31, %v4756_v61  ;;  %578 = vst [vmem:[#allocation2 + $0xf8] sm:$0xf0] %v380_v49  ;;  %1203 = vmatpush.msrb.mxu0 %v4757_v55  ;;  %1303 = vmatpush.msrb.mxu2 %v3505_v7  ;;  %v4759_v49 = vand.u32 4294901760, %v3198_v36  ;;  %v1376_v55 = vsub.f32 %v3608_v18, %v4760_v24 }
 0x155   : > { %v911_v38 = vld [vmem:[#allocation2 + $0x68] sm:$0xff]  ;;  %826 = vst [vmem:[#allocation2 + $0x88] sm:$0xf] %v818_v15  ;;  %1360 = vmatpush.msrb.mxu3 %v1359_v60  ;;  %1080 = vmatpush.msra.mxu1 %v1079_v32  ;;  %v1085_v36 = vand.u32 4294901760, %v1084_v2  ;;  %v4762_v24 = vand.u32 4294901760, %v3249_v62 }
 0x156   : > { %v3657_v52 = vand.u32 4294901760, %v911_v38  ;;  %v3670_v61 = vsub.f32 %v907_v39, %v3651_v12  ;;  %1207 = vmatpush.msrb.mxu0 %v4759_v49  ;;  %1305 = vmatpush.msrb.mxu2 %v3522_v0  ;;  %v1371_v15 = vand.u32 4294901760, %v1370_v4  ;;  %v1377_v48 = vand.u32 4294901760, %v1376_v55  ;;  %v877_v49 = vld [vmem:[%s4624_s0 + $0x8] sm:$0xf] }
 0x157   : > { %1366 = vmatpush.msrb.mxu3 %v1365_v40  ;;  %562 = vrot.lane.b32.xlu1 %v3346_v43, %s2850_s5 }
 0x158   : > { %v3667_v11 = vsub.f32 %v911_v38, %v3657_v52  ;;  %1211 = vmatpush.msrb.mxu0 %v4761_v28  ;;  %1307 = vmatpush.msrb.mxu2 %v3535_v29  ;;  %v3684_v39 = vpop.permute.xlu1 %466  ;;  %v3693_v4 = vpop.permute.xlu2 %786  ;;  %v1387_v2 = vand.u32 4294901760, %v3670_v61  ;;  %v4764_v28 = vand.u32 4294901760, %v3320_v8 }
 0x159   : > { %1372 = vmatpush.msrb.mxu3 %v1371_v15  ;;  %376 = vrot.lane.b32.xlu0 %v3335_v20, %s2841_s14  ;;  %v474_v60 = vsel %vm472_vm9, %v3384_v53, %v3684_v39  ;;  %v3691_v32 = vpop.permute.xlu0 %535  ;;  %v793_v40 = vsel %vm790_vm10, %v3332_v19, %v3693_v4  ;;  %v4763_v19 = vand.u32 4294901760, %v3274_v30 }
 0x15a   : > { %v1381_v38 = vand.u32 4294901760, %v3667_v11  ;;  %516 = vrot.lane.b32.xlu2 %v2986_v14, %s2851_s6  ;;  %1086 = vmatpush.msra.mxu1 %v1085_v36  ;;  %482 = vst [vmem:[#allocation2 + $0x188] sm:$0xf] %v474_v60  ;;  %v543_v53 = vsel %vm4697_vm4, %v3370_v3, %v3691_v32  ;;  %v1388_v62 = vsub.f32 %v3670_v61, %v1387_v2  ;;  %v4765_v60 = vand.u32 4294901760, %v3353_v13 }
 0x15b   : > { %1215 = vmatpush.msrb.mxu0 %v4762_v24  ;;  %551 = vst [vmem:[#allocation2 + $0x1a8] sm:$0xf0] %v543_v53  ;;  %v903_v55 = vld [vmem:[#allocation2 + $0xf8] sm:$0xff]  ;;  %1309 = vmatpush.msrb.mxu2 %v3549_v9 }
 0x15c   : > { %v1382_v46 = vsub.f32 %v3667_v11, %v1381_v38  ;;  %1264 = vmatpush.msrb.mxu1 %v3128_v59  ;;  %1378 = vmatpush.msrb.mxu3 %v1377_v48  ;;  %801 = vst [vmem:[#allocation2 + $0xa0] sm:$0xf0] %v793_v40  ;;  %v3714_v3 = vand.u32 4294901760, %v903_v55  ;;  %v939_v59 = vsel %vm934_vm11, %v877_v49, 0  ;;  %v1389_v8 = vand.u32 4294901760, %v1388_v62  ;;  %v2785_v40 = vld [vmem:[%s2932_s29 + $0x20] sm:$0xff] }
 0x15d   : > { %1219 = vmatpush.msrb.mxu0 %v4763_v19  ;;  %1311 = vmatpush.msrb.mxu2 %v3582_v27  ;;  %v3736_v36 = vand.u32 4294901760, %v939_v59  ;;  %vm4771_vm11 = vcmask 637952   ;;  %s2715_s29 = sshll.u32 %s2816_s15, 6 }
 0x15e   : > { %v1383_v14 = vand.u32 4294901760, %v1382_v46  ;;  %1266 = vmatpush.msrb.mxu1 %v3167_v22  ;;  %v3725_v15 = vsub.f32 %v903_v55, %v3714_v3  ;;  %v887_v55 = vld [vmem:[#allocation2 + $0x110] sm:$0xff] }
 0x15f   : > { %1223 = vmatpush.msrb.mxu0 %v4764_v28  ;;  %1313 = vmatpush.msrb.mxu2 %v3657_v52  ;;  %v3769_v19 = vsub.f32 %v939_v59, %v3736_v36 }
 0x160   : > { %1384 = vmatpush.msrb.mxu3 %v1383_v14  ;;  %1268 = vmatpush.msrb.mxu1 %v3194_v34  ;;  %v3733_v22 = vpop.permute.xlu1 %443  ;;  %v1393_v30 = vand.u32 4294901760, %v3725_v15  ;;  %v3746_v48 = vpop.permute.xlu2 %693 }
 0x161   : > { %470 = vrot.lane.b32.xlu1 %v3513_v54, %s2853_s9  ;;  %1227 = vmatpush.msrb.mxu0 %v4765_v60  ;;  %v451_v34 = vsel %vm449_vm15, %v3461_v23, %v3733_v22  ;;  %v3744_v46 = vpop.permute.xlu0 %419  ;;  %v895_v53 = vld [vmem:[#allocation2 + $0x188] sm:$0xff]  ;;  %v700_v13 = vsel %vm697_vm13, %v3410_v17, %v3746_v48 }
 0x162   : > { %1270 = vmatpush.msrb.mxu1 %v3218_v10  ;;  %1315 = vmatpush.msrb.mxu2 %v3651_v12  ;;  %459 = vst [vmem:[#allocation2 + $0x150] sm:$0xf0] %v451_v34  ;;  %v427_v10 = vsel %vm425_vm5, %v3430_v44, %v3744_v46  ;;  %v899_v23 = vld [vmem:[#allocation2 + $0x1a8] sm:$0xff]  ;;  %v1394_v49 = vsub.f32 %v3725_v15, %v1393_v30  ;;  %v3763_v14 = vand.u32 4294901760, %v895_v53  ;;  %v4766_v44 = vand.u32 4294901760, %v3398_v25 }
 0x163   : > { %539 = vrot.lane.b32.xlu0 %v2785_v40, %s2852_s8  ;;  %493 = vrot.lane.b32.xlu2 %v2785_v40, %s2854_s10  ;;  %435 = vst [vmem:[#allocation2 + $0x150] sm:$0xf] %v427_v10  ;;  %v3761_v24 = vand.u32 4294901760, %v899_v23  ;;  %v4767_v25 = vand.u32 4294901760, %v3444_v5  ;;  %v3793_v5 = vand.u32 4294901760, %v3769_v19  ;;  %s4546_s10 = scalar_lea.vmem [#allocation3], %s2715_s29 }
 0x164   : > { %1390 = vmatpush.msrb.mxu3 %v1389_v8  ;;  %1231 = vmatpush.msrb.mxu0 %v4766_v44  ;;  %708 = vst [vmem:[#allocation2 + $0xd0] sm:$0xf0] %v700_v13  ;;  %v1395_v17 = vand.u32 4294901760, %v1394_v49  ;;  %v3776_v28 = vsub.f32 %v895_v53, %v3763_v14  ;;  %v4768_v8 = vand.u32 4294901760, %v3492_v16  ;;  %v4772_v16 = vand.u32 4294901760, %v3533_v63  ;;  %v879_v44 = vld [vmem:[#allocation2 + $0x1b0] sm:$0xff] }
 0x165   : > { %1272 = vmatpush.msrb.mxu1 %v3245_v57  ;;  %1317 = vmatpush.msrb.mxu2 %v3714_v3  ;;  %v3773_v62 = vsub.f32 %v899_v23, %v3761_v24  ;;  %v3782_v57 = vand.u32 4294901760, %v887_v55  ;;  %4769 = vst [vmem:[#allocation27_spill] sm:$0xff] %v3793_v5 }
 0x166   : > { %1088 = vmatmul.f32.vlgmr.msra.gmra.mxu1 %v3539_v41  ;;  %1235 = vmatpush.msrb.mxu0 %v4767_v25  ;;  %v4695_v60 = vand.u32 4294901760, %v3776_v28  ;;  %v4775_v25 = vld [vmem:[#allocation12_spill] sm:$0xff] }
 0x167   : > { %1274 = vmatpush.msrb.mxu1 %v3269_v21  ;;  %1319 = vmatpush.msrb.mxu2 %v3761_v24  ;;  %v1399_v59 = vand.u32 4294901760, %v3773_v62  ;;  %v4770_v21 = vrot.slane %v3513_v54, 4  ;;  %v3819_v49 = vsub.f32 %v887_v55, %v3782_v57 }
 0x168   : > { %1396 = vmatpush.msrb.mxu3 %v1395_v17  ;;  %1239 = vmatpush.msrb.mxu0 %v4768_v8  ;;  %v3790_v34 = vpop.permute.xlu1 %859  ;;  %v3813_v13 = vpop.permute.xlu2 %587  ;;  %v4773_v17 = vand.u32 4294901760, %v3603_v35  ;;  %v3842_v35 = vand.u32 4294901760, %v879_v44 }
 0x169   : > { %1276 = vmatpush.msrb.mxu1 %v3315_v58  ;;  %447 = vrot.lane.b32.xlu1 %v4770_v21, %s4733_s11  ;;  %v866_v53 = vsel %vm4771_vm11, %v3283_v33, %v3790_v34  ;;  %v3802_v40 = vpop.permute.xlu0 %349  ;;  %v1400_v58 = vsub.f32 %v3773_v62, %v1399_v59  ;;  %v1406_v33 = vsub.f32 %v3776_v28, %v4695_v60  ;;  %vm4780_vm11 = vcmask 695296   ;;  %v4789_v60 = vld [vmem:[#allocation24_spill] sm:$0xff] }
 0x16a   : > { %1321 = vmatpush.msrb.mxu2 %v3763_v14  ;;  %1243 = vmatpush.msrb.mxu0 %v4772_v16  ;;  %874 = vst [vmem:[#allocation2 + $0x30] sm:$0xf] %v866_v53  ;;  %v357_v10 = vsel %vm355_vm3, %v3503_v50, %v3802_v40  ;;  %v891_v23 = vld [vmem:[#allocation2 + $0x150] sm:$0xff]  ;;  %v4777_v16 = vld [vmem:[#allocation10_spill] sm:$0xff] }
 0x16b   : > { %1278 = vmatpush.msrb.mxu1 %v3348_v45  ;;  %423 = vrot.lane.b32.xlu0 %v3513_v54, %s4734_s22  ;;  %365 = vst [vmem:[#allocation2 + $0x168] sm:$0xf0] %v357_v10  ;;  %v594_v45 = vsel %vm591_vm0, %v3555_v26, %v3813_v13  ;;  %v3828_v50 = vand.u32 4294901760, %v891_v23  ;;  %v1401_v63 = vand.u32 4294901760, %v1400_v58  ;;  %v995_v54 = vsub.f32 %v3769_v19, %v3793_v5  ;;  %v4776_v53 = vld [vmem:[#allocation16_spill] sm:$0xff] }
 0x16c   : > { %399 = vrot.lane.b32.xlu2 %v3346_v43, %s4737_s13  ;;  %1247 = vmatpush.msrb.mxu0 %v4773_v17  ;;  %602 = vst [vmem:[#allocation2 + $0x178] sm:$0xf] %v594_v45  ;;  %v4774_v26 = vand.u32 4294901760, %v3597_v6  ;;  %v1407_v8 = vand.u32 4294901760, %v1406_v33  ;;  %v4778_v45 = vld [vmem:[#allocation18_spill] sm:$0xff] }
 0x16d   : > { %1280 = vmatpush.msrb.mxu1 %v3393_v56  ;;  %1323 = vmatpush.msrb.mxu2 %v3828_v50  ;;  %v3837_v55 = vsub.f32 %v891_v23, %v3828_v50  ;;  %v4693_v56 = vand.u32 4294901760, %v3819_v49  ;;  %v3851_v6 = vand.u32 4294901760, %v995_v54 }
 0x16e   : > { %1402 = vmatpush.msrb.mxu3 %v1401_v63  ;;  %1251 = vmatpush.msrb.mxu0 %v4774_v26  ;;  %v4779_v63 = vld [vmem:[#allocation8_spill] sm:$0xff] }
 0x16f   : > { %1282 = vmatpush.msrb.mxu1 %v4775_v25  ;;  %1325 = vmatpush.msrb.mxu2 %v3782_v57  ;;  %v4694_v21 = vand.u32 4294901760, %v3837_v55  ;;  %v1418_v26 = vsub.f32 %v3819_v49, %v4693_v56  ;;  %v4781_v25 = vld [vmem:[#allocation20_spill] sm:$0xff] }
 0x170   : > { %1446 = vmatpush.msra.mxu0 %v3526_v51  ;;  %1408 = vmatpush.msrb.mxu3 %v1407_v8  ;;  %v3849_v58 = vpop.permute.xlu1 %764  ;;  %v3868_v54 = vpop.permute.xlu2 %374  ;;  %v3875_v8 = vsub.f32 %v879_v44, %v3842_v35  ;;  %v4784_v44 = vld [vmem:[#allocation19_spill] sm:$0xff] }
 0x171   : > { %1284 = vmatpush.msrb.mxu1 %v4776_v53  ;;  %353 = vrot.lane.b32.xlu1 %v3346_v43, %s4740_s24  ;;  %v770_v10 = vsel %vm378_vm8, %v4777_v16, %v3849_v58  ;;  %v3859_v23 = vpop.permute.xlu0 %836  ;;  %v1412_v33 = vsub.f32 %v3837_v55, %v4694_v21  ;;  %v4782_v53 = vld [vmem:[#allocation23_spill] sm:$0xff]  ;;  %v381_v16 = vsel %vm378_vm8, %v3632_v42, %v3868_v54  ;;  %v1419_v42 = vand.u32 4294901760, %v1418_v26 }
 0x172   : > { %1449 = vmatpush.msra.mxu0 %v3547_v47  ;;  %778 = vst [vmem:[#allocation2 + $0xa0] sm:$0xf] %v770_v10  ;;  %v843_v17 = vsel %vm4780_vm11, %v4779_v63, %v3859_v23  ;;  %v883_v43 = vld [vmem:[#allocation2 + $0x168] sm:$0xff]  ;;  %1142 = vmatmul.f32.vlgmr.msra.gmra.mxu2 %v4781_v25  ;;  %v4783_v63 = vld [vmem:[#allocation25_spill] sm:$0xff]  ;;  %vm4786_vm11 = vcmask 375808  }
 0x173   : > { %1286 = vmatpush.msrb.mxu1 %v4778_v45  ;;  %329 = vrot.lane.b32.xlu0 %v3335_v20, %s4741_s25  ;;  %851 = vst [vmem:[#allocation2 + $0x88] sm:$0xf0] %v843_v17  ;;  %v3883_v10 = vand.u32 4294901760, %v883_v43  ;;  %v1413_v45 = vand.u32 4294901760, %v1412_v33  ;;  %v4696_v17 = vand.u32 4294901760, %v3875_v8 }
 0x174   : > { %1452 = vmatpush.msra.mxu0 %v4782_v53  ;;  %389 = vst [vmem:[#allocation2 + $0x118] sm:$0xf] %v381_v16  ;;  %1184 = vmatmul.f32.vlgmr.msra.gmra.mxu3 %v4789_v60 }
 0x175   : > { %1288 = vmatpush.msrb.mxu1 %v4783_v63  ;;  %997 = vmatmul.f32.gmra.mxu0 %v3851_v6  ;;  %579 = vst [vmem:[#allocation2 + $0x190] sm:$0xf0] %v381_v16  ;;  %v3890_v20 = vsub.f32 %v883_v43, %v3883_v10  ;;  %v4785_v43 = vld [vmem:[#allocation9_spill] sm:$0xff] }
 0x176   : > { %1455 = vmatpush.msra.mxu0 %v3591_v31  ;;  %1327 = vmatpush.msrb.mxu2 %v3883_v10 }
 0x177   : > { %1290 = vmatpush.msrb.mxu1 %v4784_v44  ;;  %1414 = vmatpush.msrb.mxu3 %v1413_v45  ;;  %v1423_v33 = vand.u32 4294901760, %v3890_v20  ;;  %v4787_v44 = vand.u32 4294901760, %v3526_v51 }
 0x178   : > { %1458 = vmatpush.msra.mxu0 %v3608_v18  ;;  %1329 = vmatpush.msrb.mxu2 %v3842_v35  ;;  %v3898_v16 = vpop.permute.xlu1 %741  ;;  %v3915_v21 = vpop.permute.xlu2 %537 }
 0x179   : > { %1500 = vmatpush.msra.mxu1 %v3505_v7  ;;  %1420 = vmatpush.msrb.mxu3 %v1419_v42  ;;  %v748_v26 = vsel %vm4786_vm11, %v4785_v43, %v3898_v16  ;;  %v3905_v45 = vpop.permute.xlu0 %716  ;;  %v1424_v63 = vsub.f32 %v3890_v20, %v1423_v33  ;;  %v4788_v42 = vld [vmem:[#allocation13_spill] sm:$0xff]  ;;  %v1430_v43 = vsub.f32 %v3875_v8, %v4696_v17  ;;  %v4791_v17 = vand.u32 4294901760, %v4782_v53 }
 0x17a   : > { %1461 = vmatpush.msra.mxu0 %v3667_v11  ;;  %1545 = vmatpush.msra.mxu2 %v4787_v44  ;;  %756 = vst [vmem:[#allocation2 + $0x160] sm:$0xf0] %v748_v26  ;;  %v723_v56 = vsel %vm720_vm12, %v4788_v42, %v3905_v45  ;;  %v544_v51 = vsel %vm4697_vm4, %v3691_v32, %v3915_v21  ;;  %v4790_v44 = vand.u32 4294901760, %v3547_v47  ;;  %v932_v42 = vld [vmem:[#allocation2 + $0x30] sm:$0xf]  ;;  %v4792_v47 = vand.u32 4294901760, %v3591_v31 }
 0x17b   : > { %1502 = vmatpush.msra.mxu1 %v3522_v0  ;;  %731 = vst [vmem:[#allocation2 + $0x160] sm:$0xf] %v723_v56  ;;  %v1425_v26 = vand.u32 4294901760, %v1424_v63  ;;  %v1431_v56 = vand.u32 4294901760, %v1430_v43  ;;  %v949_v32 = vsel %vm941_vm7, %v932_v42, 0  ;;  %v4793_v43 = vand.u32 4294901760, %v3608_v18  ;;  %1147 = vmatmul.f32.gmra.mxu2 %v3769_v19 }
 0x17c   : > { %1464 = vmatpush.msra.mxu0 %v3670_v61  ;;  %552 = vst [vmem:[#allocation2 + $0x1b8] sm:$0xf0] %v544_v51  ;;  %1549 = vmatpush.msra.mxu2 %v4790_v44  ;;  %v4794_v51 = vld [vmem:[#allocation21_spill] sm:$0xff]  ;;  %vm4796_vm11 = vcmask 138240   ;;  %v924_v18 = vld [vmem:[#allocation2 + $0xa0] sm:$0xff]  ;;  %vm4799_vm4 = vcmask 179200  }
 0x17d   : > { %1504 = vmatpush.msra.mxu1 %v3535_v29  ;;  %1426 = vmatpush.msrb.mxu3 %v1425_v26  ;;  %v4795_v26 = vld [vmem:[#allocation11_spill] sm:$0xff]  ;;  %v3975_v11 = vand.u32 4294901760, %v924_v18 }
 0x17e   : > { %1092 = vmatmul.f32.gmra.mxu1 %v3736_v36  ;;  %1467 = vmatpush.msra.mxu0 %v3725_v15 }
 0x17f   : > { %1506 = vmatpush.msra.mxu1 %v3549_v9  ;;  %1553 = vmatpush.msra.mxu2 %v4791_v17  ;;  %v928_v17 = vld [vmem:[#allocation2 + $0x88] sm:$0xff] }
 0x180   : > { %1470 = vmatpush.msra.mxu0 %v3773_v62  ;;  %1432 = vmatpush.msrb.mxu3 %v1431_v56  ;;  %v3940_v63 = vpop.permute.xlu1 %656  ;;  %v3953_v42 = vpop.permute.xlu2 %468  ;;  %v3955_v56 = vand.u32 4294901760, %v949_v32  ;;  %v4800_v62 = vand.u32 4294901760, %v3776_v28 }
 0x181   : > { %1508 = vmatpush.msra.mxu1 %v3582_v27  ;;  %1557 = vmatpush.msra.mxu2 %v4792_v47  ;;  %v3942_v53 = vpop.permute.xlu0 %633  ;;  %v663_v31 = vsel %vm660_vm14, %v4794_v51, %v3940_v63  ;;  %v3965_v47 = vand.u32 4294901760, %v928_v17 }
 0x182   : > { %1473 = vmatpush.msra.mxu0 %v3776_v28  ;;  %1610 = vmatpush.msra.mxu3 %v3505_v7  ;;  %v640_v44 = vsel %vm4796_vm11, %v4795_v26, %v3942_v53  ;;  %671 = vst [vmem:[#allocation2 + $0x148] sm:$0xf0] %v663_v31  ;;  %v475_v7 = vsel %vm472_vm9, %v3684_v39, %v3953_v42  ;;  %vm4797_vm11 = vcmask 637952   ;;  %v4801_v28 = vand.u32 4294901760, %v3837_v55 }
 0x183   : > { %1510 = vmatpush.msra.mxu1 %v3657_v52  ;;  %1561 = vmatpush.msra.mxu2 %v4793_v43  ;;  %648 = vst [vmem:[#allocation2 + $0x148] sm:$0xf] %v640_v44  ;;  %v920_v43 = vld [vmem:[#allocation2 + $0x160] sm:$0xff]  ;;  %v3973_v39 = vsub.f32 %v949_v32, %v3955_v56  ;;  %v3985_v61 = vsub.f32 %v928_v17, %v3965_v47 }
 0x184   : > { %1476 = vmatpush.msra.mxu0 %v3837_v55  ;;  %1612 = vmatpush.msra.mxu3 %v3522_v0  ;;  %483 = vst [vmem:[#allocation2 + $0x138] sm:$0xf] %v475_v7  ;;  %v3982_v0 = vand.u32 4294901760, %v920_v43  ;;  %v4002_v26 = vsub.f32 %v924_v18, %v3975_v11 }
 0x185   : > { %1512 = vmatpush.msra.mxu1 %v3651_v12  ;;  %1565 = vmatpush.msra.mxu2 %v1381_v38  ;;  %v916_v38 = vld [vmem:[#allocation2 + $0xd0] sm:$0xff]  ;;  %v4708_v31 = vand.u32 4294901760, %v3973_v39  ;;  %v4707_v7 = vand.u32 4294901760, %v3985_v61 }
 0x186   : > { %1479 = vmatpush.msra.mxu0 %v3819_v49  ;;  %1614 = vmatpush.msra.mxu3 %v3535_v29  ;;  %v3991_v32 = vand.u32 4294901760, %v916_v38  ;;  %v4015_v18 = vsub.f32 %v920_v43, %v3982_v0 }
 0x187   : > { %1514 = vmatpush.msra.mxu1 %v3714_v3  ;;  %1569 = vmatpush.msra.mxu2 %v1387_v2 }
 0x188   : > { %1482 = vmatpush.msra.mxu0 %v3890_v20  ;;  %v862_v29 = vpop.permute.xlu1 %861  ;;  %1616 = vmatpush.msra.mxu3 %v3549_v9  ;;  %v789_v51 = vpop.permute.xlu2 %788  ;;  %v4705_v43 = vand.u32 4294901760, %v4015_v18 }
 0x189   : > { %1516 = vmatpush.msra.mxu1 %v3761_v24  ;;  %1253 = vmatmul.f32.vlgmr.msrb.gmra.mxu0 %v3539_v41  ;;  %v3989_v2 = vpop.permute.xlu0 %610  ;;  %v867_v15 = vsel %vm4797_vm11, %v3790_v34, %v862_v29  ;;  %v794_v9 = vsel %vm790_vm10, %v3693_v4, %v789_v51  ;;  %v4021_v4 = vsub.f32 %v916_v38, %v3991_v32  ;;  %vm4807_vm10 = vcmask 695296  }
 0x18a   : > { %1573 = vmatpush.msra.mxu2 %v1393_v30  ;;  %1485 = vmatpush.msra.mxu0 %v3875_v8  ;;  %v4798_v30 = vld [vmem:[#allocation14_spill] sm:$0xff]  ;;  %875 = vst [vmem:[#allocation2 + $0x198] sm:$0xf] %v867_v15  ;;  %v912_v34 = vld [vmem:[#allocation2 + $0x148] sm:$0xff]  ;;  %vm4813_vm11 = vcmask 375808  }
 0x18b   : > { %1518 = vmatpush.msra.mxu1 %v3763_v14  ;;  %v617_v17 = vsel %vm4799_vm4, %v4798_v30, %v3989_v2  ;;  %1618 = vmatpush.msra.mxu3 %v3582_v27  ;;  %v4011_v44 = vand.u32 4294901760, %v912_v34  ;;  %802 = vst [vmem:[#allocation2 + $0x158] sm:$0xf0] %v794_v9  ;;  %v1698_v27 = vsub.f32 %v3973_v39, %v4708_v31  ;;  %v4703_v55 = vand.u32 4294901760, %v4021_v4  ;;  %v4805_v9 = vld [vmem:[#allocation26_spill] sm:$0xff] }
 0x18c   : > { %1649 = vmatpush.msrb.mxu0 %v3955_v56  ;;  %1577 = vmatpush.msra.mxu2 %v1399_v59  ;;  %625 = vst [vmem:[#allocation2 + $0x178] sm:$0xf0] %v617_v17  ;;  %v4706_v59 = vand.u32 4294901760, %v4002_v26  ;;  %v4803_v17 = vld [vmem:[#allocation15_spill] sm:$0xff]  ;;  %vm4804_vm4 = vcmask 498688  }
 0x18d   : > { %1520 = vmatpush.msra.mxu1 %v3828_v50  ;;  %1620 = vmatpush.msra.mxu3 %v3657_v52  ;;  %v1704_v52 = vsub.f32 %v3985_v61, %v4707_v7  ;;  %v4039_v38 = vsub.f32 %v912_v34, %v4011_v44  ;;  %v1699_v30 = vand.u32 4294901760, %v1698_v27 }
 0x18e   : > { %1651 = vmatpush.msrb.mxu0 %v3965_v47  ;;  %1581 = vmatpush.msra.mxu2 %v4800_v62 }
 0x18f   : > { %1522 = vmatpush.msra.mxu1 %v3782_v57  ;;  %1622 = vmatpush.msra.mxu3 %v3651_v12  ;;  %v4802_v12 = vand.u32 4294901760, %v3819_v49 }
 0x190   : > { %1653 = vmatpush.msrb.mxu0 %v3975_v11  ;;  %1585 = vmatpush.msra.mxu2 %v4801_v28  ;;  %v4043_v29 = vpop.permute.xlu1 %514  ;;  %v719_v62 = vpop.permute.xlu2 %718  ;;  %v1710_v28 = vsub.f32 %v4002_v26, %v4706_v59 }
 0x191   : > { %1524 = vmatpush.msra.mxu1 %v3883_v10  ;;  %v4045_v15 = vpop.permute.xlu0 %560  ;;  %v521_v51 = vsel %vm4804_vm4, %v4803_v17, %v4043_v29  ;;  %1624 = vmatpush.msra.mxu3 %v3714_v3  ;;  %v724_v49 = vsel %vm720_vm12, %v3905_v45, %v719_v62  ;;  %v1716_v17 = vsub.f32 %v4015_v18, %v4705_v43  ;;  %v4702_v3 = vand.u32 4294901760, %v4039_v38 }
 0x192   : > { %1655 = vmatpush.msrb.mxu0 %v3982_v0  ;;  %1292 = vmatmul.f32.vlgmr.msrb.gmra.mxu1 %v3539_v41  ;;  %v567_v34 = vsel %vm564_vm2, %v4805_v9, %v4045_v15  ;;  %529 = vst [vmem:[#allocation2 + $0x1b8] sm:$0xf] %v521_v51  ;;  %v1711_v20 = vand.u32 4294901760, %v1710_v28  ;;  %vm4810_vm12 = vcmask 138240  }
 0x193   : > { %1526 = vmatpush.msra.mxu1 %v3842_v35  ;;  %1589 = vmatpush.msra.mxu2 %v4802_v12  ;;  %v908_v27 = vld [vmem:[#allocation2 + $0x178] sm:$0xff]  ;;  %v1705_v12 = vand.u32 4294901760, %v1704_v52  ;;  %575 = vst [vmem:[#allocation2 + $0x190] sm:$0xf] %v567_v34  ;;  %v4806_v52 = vand.u32 4294901760, %v3875_v8 }
 0x194   : > { %1657 = vmatpush.msrb.mxu0 %v3991_v32  ;;  %v4069_v9 = vand.u32 4294901760, %v908_v27  ;;  %1626 = vmatpush.msra.mxu3 %v3761_v24  ;;  %732 = vst [vmem:[#allocation2 + $0x20] sm:$0xf] %v724_v49  ;;  %v1717_v24 = vand.u32 4294901760, %v1716_v17 }
 0x195   : > { %1700 = vmatpush.msrb.mxu1 %v1699_v30  ;;  %1593 = vmatpush.msra.mxu2 %v1423_v33  ;;  %v1722_v33 = vsub.f32 %v4021_v4, %v4703_v55  ;;  %v1728_v30 = vsub.f32 %v4039_v38, %v4702_v3 }
 0x196   : > { %1659 = vmatpush.msrb.mxu0 %v4011_v44  ;;  %1190 = vmatmul.f32.gmra.mxu3 %v3793_v5  ;;  %v4079_v45 = vsub.f32 %v908_v27, %v4069_v9 }
 0x197   : > { %1706 = vmatpush.msrb.mxu1 %v1705_v12  ;;  %1597 = vmatpush.msra.mxu2 %v4806_v52 }
 0x198   : > { %1628 = vmatpush.msra.mxu3 %v3763_v14  ;;  %1335 = vmatmul.f32.vlgmr.msrb.gmra.mxu2 %v3619_v37  ;;  %v4701_v51 = vand.u32 4294901760, %v4079_v45  ;;  %v839_v34 = vpop.permute.xlu1 %838  ;;  %v1723_v14 = vand.u32 4294901760, %v1722_v33  ;;  %v696_v49 = vpop.permute.xlu2 %695 }
 0x199   : > { %1712 = vmatpush.msrb.mxu1 %v1711_v20  ;;  %1792 = vmatpush.msrb.mxu2 %v3973_v39  ;;  %v814_v62 = vpop.permute.xlu0 %813  ;;  %v844_v8 = vsel %vm4807_vm10, %v3859_v23, %v839_v34  ;;  %v900_v12 = vld [vmem:[#allocation2 + $0x1b8] sm:$0xff]  ;;  %v1729_v23 = vand.u32 4294901760, %v1728_v30  ;;  %vm4816_vm10 = vcmask 1031168  }
 0x19a   : > { %1630 = vmatpush.msra.mxu3 %v3828_v50  ;;  %1661 = vmatpush.msrb.mxu0 %v4069_v9  ;;  %v819_v28 = vsel %vm815_vm6, %v3634_v1, %v814_v62  ;;  %v1734_v27 = vsub.f32 %v4079_v45, %v4701_v51  ;;  %852 = vst [vmem:[#allocation2 + $0x170] sm:$0xf0] %v844_v8  ;;  %v904_v17 = vld [vmem:[#allocation2 + $0x190] sm:$0xff]  ;;  %v4103_v20 = vand.u32 4294901760, %v900_v12  ;;  %v4808_v62 = vld [vmem:[#allocation17_spill] sm:$0xff]  ;;  %vm4809_vm6 = vcmask 539648  }
 0x19b   : > { %1718 = vmatpush.msrb.mxu1 %v1717_v24  ;;  %1795 = vmatpush.msrb.mxu2 %v3985_v61  ;;  %v701_v50 = vsel %vm697_vm13, %v3746_v48, %v696_v49  ;;  %827 = vst [vmem:[#allocation2 + $0x170] sm:$0xf] %v819_v28  ;;  %v4105_v1 = vand.u32 4294901760, %v904_v17  ;;  %vm4811_vm13 = vcmask 179200  }
 0x19c   : > { %1632 = vmatpush.msra.mxu3 %v3782_v57  ;;  %1257 = vmatmul.f32.gmra.mxu0 %v3736_v36  ;;  %709 = vst [vmem:[#allocation2 + $0x1a0] sm:$0xf0] %v701_v50  ;;  %v1735_v57 = vand.u32 4294901760, %v1734_v27  ;;  %v4111_v33 = vsub.f32 %v900_v12, %v4103_v20 }
 0x19d   : > { %1724 = vmatpush.msrb.mxu1 %v1723_v14  ;;  %1798 = vmatpush.msrb.mxu2 %v4002_v26  ;;  %v4115_v48 = vsub.f32 %v904_v17, %v4105_v1 }
 0x19e   : > { %1634 = vmatpush.msra.mxu3 %v3883_v10  ;;  %v4699_v52 = vand.u32 4294901760, %v4111_v33  ;;  %1663 = vmatpush.msrb.mxu0 %v4105_v1 }
 0x19f   : > { %1730 = vmatpush.msrb.mxu1 %v1729_v23  ;;  %1434 = vmatmul.f32.vlgmr.msrb.gmra.mxu3 %v3539_v41  ;;  %v4700_v10 = vand.u32 4294901760, %v4115_v48 }
 0x1a0   : > { %1801 = vmatpush.msrb.mxu2 %v4015_v18  ;;  %1636 = vmatpush.msra.mxu3 %v3842_v35  ;;  %v767_v24 = vpop.permute.xlu1 %766  ;;  %v1746_v34 = vsub.f32 %v4111_v33, %v4699_v52 }
 0x1a1   : > { %1736 = vmatpush.msrb.mxu1 %v1735_v57  ;;  %v4124_v30 = vpop.permute.xlu0 %491  ;;  %1343 = vmatmul.f32.gmra.mxu2 %v3851_v6  ;;  %v771_v35 = vsel %vm378_vm8, %v3849_v58, %v767_v24  ;;  %v636_v8 = vpop.permute.xlu2 %635  ;;  %v1740_v28 = vsub.f32 %v4115_v48, %v4700_v10 }
 0x1a2   : > { %1846 = vmatpush.msrb.mxu3 %v3955_v56  ;;  %1804 = vmatpush.msrb.mxu2 %v4021_v4  ;;  %v498_v14 = vsel %vm4809_vm6, %v4808_v62, %v4124_v30  ;;  %779 = vst [vmem:[#allocation2 + $0x158] sm:$0xf] %v771_v35  ;;  %v641_v49 = vsel %vm4810_vm12, %v3942_v53, %v636_v8  ;;  %v1747_v27 = vand.u32 4294901760, %v1746_v34  ;;  %v4812_v62 = vld [vmem:[#allocation22_spill] sm:$0xff] }
 0x1a3   : > { %1665 = vmatpush.msrb.mxu0 %v4103_v20  ;;  %506 = vst [vmem:[#allocation2 + $0x138] sm:$0xf0] %v498_v14  ;;  %1296 = vmatmul.f32.gmra.mxu1 %v3736_v36  ;;  %v1741_v58 = vand.u32 4294901760, %v1740_v28 }
 0x1a4   : > { %1848 = vmatpush.msrb.mxu3 %v3965_v47  ;;  %1807 = vmatpush.msrb.mxu2 %v4039_v38  ;;  %649 = vst [vmem:[#allocation2 + $0x8] sm:$0xf] %v641_v49  ;;  %v933_v49 = vld [vmem:[#allocation2 + $0x198] sm:$0xf] }
 0x1a5   : > { %1488 = vmatmul.f32.vlgmr.msra.gmra.mxu0 %v4781_v25  ;;  %1742 = vmatpush.msrb.mxu1 %v1741_v58 }
 0x1a6   : > { %1850 = vmatpush.msrb.mxu3 %v3975_v11  ;;  %1810 = vmatpush.msrb.mxu2 %v4079_v45 }
 0x1a7   : > { %1438 = vmatmul.f32.gmra.mxu3 %v3736_v36  ;;  %1748 = vmatpush.msrb.mxu1 %v1747_v27 }
 0x1a8   : > { %1813 = vmatpush.msrb.mxu2 %v4115_v48  ;;  %1852 = vmatpush.msrb.mxu3 %v3982_v0  ;;  %v4152_v53 = vpop.permute.xlu1 %445 }
 0x1a9   : > { %v4154_v12 = vpop.permute.xlu0 %421  ;;  %1599 = vmatmul.f32.vlgmr.msra.gmra.mxu2 %v3539_v41  ;;  %v452_v50 = vsel %vm449_vm15, %v3733_v22, %v4152_v53  ;;  %v613_v23 = vpop.permute.xlu2 %612 }
 0x1aa   : > { %1816 = vmatpush.msrb.mxu2 %v4111_v33  ;;  %1854 = vmatpush.msrb.mxu3 %v3991_v32  ;;  %v428_v17 = vsel %vm425_vm5, %v3744_v46, %v4154_v12  ;;  %460 = vst [vmem:[#allocation2 + $0x108] sm:$0xf0] %v452_v50  ;;  %v618_v57 = vsel %vm4811_vm13, %v3989_v2, %v613_v23  ;;  %v896_v24 = vld [vmem:[#allocation2 + $0x138] sm:$0xff]  ;;  %v952_v23 = vsel %vm941_vm7, %v933_v49, 0  ;;  %v4815_v49 = vld [vmem:[#allocation7_spill] sm:$0xff] }
 0x1ab   : > { %436 = vst [vmem:[#allocation2 + $0x108] sm:$0xf] %v428_v17  ;;  %1530 = vmatmul.f32.vlgmr.msra.gmra.mxu1 %v4789_v60  ;;  %v4167_v34 = vand.u32 4294901760, %v896_v24 }
 0x1ac   : > { %1856 = vmatpush.msrb.mxu3 %v4011_v44  ;;  %626 = vst [vmem:[#allocation2 + $0xc8] sm:$0xf0] %v618_v57 }
 0x1ad   : > { %1493 = vmatmul.f32.gmra.mxu0 %v3769_v19  ;;  %v4174_v22 = vsub.f32 %v896_v24, %v4167_v34  ;;  %v929_v24 = vld [vmem:[#allocation2 + $0x170] sm:$0xff] }
 0x1ae   : > { %1858 = vmatpush.msrb.mxu3 %v4069_v9  ;;  %1667 = vmatpush.msrb.mxu0 %v4167_v34 }
 0x1af   : > { %1638 = vmatmul.f32.vlgmr.msra.gmra.mxu3 %v3539_v41  ;;  %1819 = vmatpush.msrb.mxu2 %v4174_v22  ;;  %v4698_v46 = vand.u32 4294901760, %v4174_v22 }
 0x1b0   : > { %1860 = vmatpush.msrb.mxu3 %v4105_v1  ;;  %v4180_v2 = vpop.permute.xlu1 %397 }
 0x1b1   : > { %v744_v35 = vpop.permute.xlu0 %743  ;;  %v404_v14 = vsel %vm401_vm1, %v4812_v62, %v4180_v2  ;;  %v1752_v28 = vsub.f32 %v4174_v22, %v4698_v46  ;;  %1603 = vmatmul.f32.gmra.mxu2 %v3736_v36  ;;  %v4206_v62 = vand.u32 4294901760, %v952_v23  ;;  %v4221_v46 = vand.u32 4294901760, %v929_v24 }
 0x1b2   : > { %1862 = vmatpush.msrb.mxu3 %v4103_v20  ;;  %v749_v8 = vsel %vm4813_vm11, %v3898_v16, %v744_v35  ;;  %412 = vst [vmem:[#allocation2 + $0x118] sm:$0xf0] %v404_v14  ;;  %v892_v58 = vld [vmem:[#allocation2 + $0x108] sm:$0xff] }
 0x1b3   : > { %757 = vst [vmem:[#allocation2 + $0x20] sm:$0xf0] %v749_v8  ;;  %v4192_v50 = vand.u32 4294901760, %v892_v58  ;;  %v1753_v17 = vand.u32 4294901760, %v1752_v28  ;;  %1536 = vmatmul.f32.gmra.mxu1 %v3793_v5  ;;  %v925_v8 = vld [vmem:[#allocation2 + $0x158] sm:$0xff] }
 0x1b4   : > { %1864 = vmatpush.msrb.mxu3 %v4167_v34  ;;  %v517_v27 = vpop.permute.xlu2 %516  ;;  %v4228_v3 = vand.u32 4294901760, %v925_v8 }
 0x1b5   : > { %v522_v16 = vsel %vm4804_vm4, %v4043_v29, %v517_v27  ;;  %1669 = vmatpush.msrb.mxu0 %v4192_v50  ;;  %1754 = vmatpush.msrb.mxu1 %v1753_v17  ;;  %v4200_v57 = vsub.f32 %v892_v58, %v4192_v50 }
 0x1b6   : > { %530 = vst [vmem:[#allocation2 + $0x28] sm:$0xf] %v522_v16  ;;  %1866 = vmatpush.msrb.mxu3 %v4192_v50  ;;  %v880_v16 = vld [vmem:[#allocation2 + $0xd8] sm:$0xff]  ;;  %v4250_v7 = vsub.f32 %v925_v8, %v4228_v3 }
 0x1b7   : > { %1822 = vmatpush.msrb.mxu2 %v4200_v57  ;;  %1642 = vmatmul.f32.gmra.mxu3 %v3736_v36  ;;  %v4704_v35 = vand.u32 4294901760, %v4200_v57 }
 0x1b8   : > { %v4208_v29 = vpop.permute.xlu1 %351 }
 0x1b9   : > { %v4210_v14 = vpop.permute.xlu0 %327  ;;  %v358_v28 = vsel %vm355_vm3, %v3802_v40, %v4208_v29  ;;  %v888_v27 = vld [vmem:[#allocation2 + $0x118] sm:$0xff]  ;;  %v1758_v17 = vsub.f32 %v4200_v57, %v4704_v35  ;;  %v4226_v40 = vsub.f32 %v952_v23, %v4206_v62  ;;  %v4240_v23 = vsub.f32 %v929_v24, %v4221_v46 }
 0x1ba   : > { %4814 = vst [vmem:[#allocation12_spill] sm:$0xff] %v4210_v14  ;;  %v334_v58 = vsel %vm4816_vm10, %v4815_v49, %v4210_v14  ;;  %v4223_v52 = vand.u32 4294901760, %v888_v27  ;;  %v921_v10 = vld [vmem:[#allocation2 + $0x20] sm:$0xff] }
 0x1bb   : > { %366 = vst [vmem:[#allocation2 + $0x130] sm:$0xf0] %v358_v28  ;;  %v1759_v51 = vand.u32 4294901760, %v1758_v17  ;;  %v917_v49 = vld [vmem:[#allocation2 + $0x1a0] sm:$0xff]  ;;  %v4235_v28 = vand.u32 4294901760, %v880_v16  ;;  %v4242_v17 = vand.u32 4294901760, %v921_v10 }
 0x1bc   : > { %4817 = vst [vmem:[#allocation16_spill] sm:$0xff] %v4223_v52  ;;  %1671 = vmatpush.msrb.mxu0 %v4223_v52  ;;  %1868 = vmatpush.msrb.mxu3 %v4223_v52  ;;  %v4233_v35 = vsub.f32 %v888_v27, %v4223_v52  ;;  %v4246_v59 = vand.u32 4294901760, %v917_v49  ;;  %v4714_v27 = vand.u32 4294901760, %v4240_v23 }
 0x1bd   : > { %342 = vst [vmem:[#allocation2 + $0x130] sm:$0xf] %v334_v58  ;;  %v494_v55 = vpop.permute.xlu2 %493  ;;  %1760 = vmatpush.msrb.mxu1 %v1759_v51  ;;  %v4264_v8 = vsub.f32 %v921_v10, %v4242_v17 }
 0x1be   : > { %4818 = vst [vmem:[#allocation10_spill] sm:$0xff] %v4235_v28  ;;  %v499_v58 = vsel %vm4809_vm6, %v4124_v30, %v494_v55  ;;  %1825 = vmatpush.msrb.mxu2 %v4233_v35  ;;  %v4713_v43 = vand.u32 4294901760, %v4233_v35  ;;  %v4256_v30 = vsub.f32 %v880_v16, %v4235_v28  ;;  %v4267_v5 = vsub.f32 %v917_v49, %v4246_v59 }
 0x1bf   : > { %507 = vst [vmem:[#allocation2 + $0x140] sm:$0xf0] %v499_v58 }
 0x1c0   : > { %v590_v31 = vpop.permute.xlu1 %589  ;;  %v1764_v51 = vsub.f32 %v4233_v35, %v4713_v43  ;;  %v4819_v43 = vand.u32 4294901760, %v4226_v40  ;;  %v4716_v10 = vand.u32 4294901760, %v4256_v30 }
 0x1c1   : > { %v659_v55 = vpop.permute.xlu0 %658  ;;  %v595_v24 = vsel %vm591_vm0, %v3813_v13, %v590_v31 }
 0x1c2   : > { %v664_v58 = vsel %vm660_vm14, %v3940_v63, %v659_v55  ;;  %603 = vst [vmem:[#allocation2 + $0xc8] sm:$0xf] %v595_v24  ;;  %v1765_v14 = vand.u32 4294901760, %v1764_v51  ;;  %v2044_v13 = vsub.f32 %v4226_v40, %v4819_v43  ;;  %v4715_v63 = vand.u32 4294901760, %v4250_v7 }
 0x1c3   : > { %672 = vst [vmem:[#allocation2 + $0x8] sm:$0xf0] %v664_v58  ;;  %v2050_v43 = vsub.f32 %v4240_v23, %v4714_v27  ;;  %v4718_v51 = vand.u32 4294901760, %v4264_v8  ;;  %v4820_v58 = vand.u32 4294901760, %v3973_v39 }
 0x1c4   : > { %v884_v52 = vld [vmem:[#allocation2 + $0x130] sm:$0xff]  ;;  %1766 = vmatpush.msrb.mxu1 %v1765_v14  ;;  %v2056_v24 = vsub.f32 %v4250_v7, %v4715_v63 }
 0x1c5   : > { %v4269_v16 = vand.u32 4294901760, %v884_v52  ;;  %v2051_v27 = vand.u32 4294901760, %v2050_v43  ;;  %v2062_v39 = vsub.f32 %v4264_v8, %v4718_v51 }
 0x1c6   : > { %v400_v31 = vpop.permute.xlu2 %399  ;;  %v2057_v51 = vand.u32 4294901760, %v2056_v24 }
 0x1c7   : > { %v405_v55 = vsel %vm401_vm1, %v4180_v2, %v400_v31  ;;  %1673 = vmatpush.msrb.mxu0 %v4269_v16  ;;  %1870 = vmatpush.msrb.mxu3 %v4269_v16  ;;  %v4281_v49 = vsub.f32 %v884_v52, %v4269_v16  ;;  %v2045_v2 = vand.u32 4294901760, %v2044_v13 }
 0x1c8   : > { %413 = vst [vmem:[#allocation2 + $0x98] sm:$0xf0] %v405_v55  ;;  %v1776_v55 = vsub.f32 %v4256_v30, %v4716_v10  ;;  %v4821_v10 = vand.u32 4294901760, %v3985_v61  ;;  %v4823_v61 = vand.u32 4294901760, %v4002_v26 }
 0x1c9   : > { %1675 = vmatpush.msrb.mxu0 %v4235_v28  ;;  %1828 = vmatpush.msrb.mxu2 %v4281_v49  ;;  %v4717_v52 = vand.u32 4294901760, %v4281_v49  ;;  %v563_v31 = vpop.permute.xlu1 %562 }
 0x1ca   : > { %1872 = vmatpush.msrb.mxu3 %v4235_v28  ;;  %v568_v13 = vsel %vm564_vm2, %v4045_v15, %v563_v31  ;;  %v4822_v15 = vand.u32 4294901760, %v4267_v5  ;;  %1681 = vmatmul.f32.vlgmr.msrb.gmra.mxu0 %v3619_v37 }
 0x1cb   : > { %1891 = vmatpush.msra.mxu0 %v4820_v58  ;;  %1831 = vmatpush.msrb.mxu2 %v4256_v30  ;;  %v1770_v63 = vsub.f32 %v4281_v49, %v4717_v52  ;;  %v909_v58 = vld [vmem:[#allocation2 + $0xc8] sm:$0xff]  ;;  %576 = vst [vmem:[#allocation2 + $0xb8] sm:$0xf] %v568_v13  ;;  %v377_v14 = vpop.permute.xlu0 %376 }
 0x1cc   : > { %2046 = vmatpush.msra.mxu3 %v2045_v2  ;;  %v2068_v43 = vsub.f32 %v4267_v5, %v4822_v15  ;;  %v913_v2 = vld [vmem:[#allocation2 + $0x8] sm:$0xff]  ;;  %v4315_v31 = vand.u32 4294901760, %v909_v58  ;;  %v382_v52 = vsel %vm378_vm8, %v3868_v54, %v377_v14  ;;  %v2063_v54 = vand.u32 4294901760, %v2062_v39  ;;  %1834 = vmatmul.f32.vlgmr.msrb.gmra.mxu2 %v4781_v25 }
 0x1cd   : > { %1895 = vmatpush.msra.mxu0 %v4821_v10  ;;  %1995 = vmatpush.msra.mxu2 %v4206_v62  ;;  %v1771_v28 = vand.u32 4294901760, %v1770_v63  ;;  %v4319_v13 = vand.u32 4294901760, %v913_v2  ;;  %390 = vst [vmem:[#allocation2 + $0x98] sm:$0xf] %v382_v52  ;;  %v4824_v14 = vand.u32 4294901760, %v4015_v18  ;;  %vm4827_vm8 = vcmask 457728  }
 0x1ce   : > { %2052 = vmatpush.msra.mxu3 %v2051_v27  ;;  %v4326_v10 = vsub.f32 %v909_v58, %v4315_v31  ;;  %580 = vst [vmem:[#allocation2 + $0xb8] sm:$0xf0] %v382_v52  ;;  %v1777_v27 = vand.u32 4294901760, %v1776_v55  ;;  %v2069_v24 = vand.u32 4294901760, %v2068_v43  ;;  %v4828_v43 = vand.u32 4294901760, %v4079_v45 }
 0x1cf   : > { %1899 = vmatpush.msra.mxu0 %v4823_v61  ;;  %1997 = vmatpush.msra.mxu2 %v4221_v46  ;;  %v4329_v63 = vsub.f32 %v913_v2, %v4319_v13  ;;  %v4829_v2 = vand.u32 4294901760, %v4115_v48 }
 0x1d0   : > { %2058 = vmatpush.msra.mxu3 %v2057_v51  ;;  %1772 = vmatpush.msrb.mxu1 %v1771_v28  ;;  %v2079_v26 = vand.u32 4294901760, %v4326_v10  ;;  %v4825_v51 = vand.u32 4294901760, %v4021_v4  ;;  %v4826_v4 = vand.u32 4294901760, %v4039_v38 }
 0x1d1   : > { %1903 = vmatpush.msra.mxu0 %v4824_v14  ;;  %1999 = vmatpush.msra.mxu2 %v4228_v3  ;;  %v2073_v58 = vand.u32 4294901760, %v4329_v63 }
 0x1d2   : > { %2064 = vmatpush.msra.mxu3 %v2063_v54  ;;  %1778 = vmatpush.msrb.mxu1 %v1777_v27  ;;  %v2080_v52 = vsub.f32 %v4326_v10, %v2079_v26 }
 0x1d3   : > { %1907 = vmatpush.msra.mxu0 %v4825_v51  ;;  %2001 = vmatpush.msra.mxu2 %v4242_v17  ;;  %v471_v28 = vpop.permute.xlu1 %470  ;;  %v2074_v18 = vsub.f32 %v4329_v63, %v2073_v58 }
 0x1d4   : > { %1956 = vmatpush.msra.mxu1 %v3955_v56  ;;  %2070 = vmatpush.msra.mxu3 %v2069_v24  ;;  %v476_v55 = vsel %vm472_vm9, %v3953_v42, %v471_v28  ;;  %v889_v51 = vld [vmem:[#allocation2 + $0x98] sm:$0xff]  ;;  %vm2385_vm9 = vcmask 3072  }
 0x1d5   : > { %1911 = vmatpush.msra.mxu0 %v4826_v4  ;;  %484 = vst [vmem:[#allocation2 + $0x140] sm:$0xf] %v476_v55  ;;  %v540_v56 = vpop.permute.xlu0 %539  ;;  %2003 = vmatpush.msra.mxu2 %v4246_v59  ;;  %v2075_v39 = vand.u32 4294901760, %v2074_v18  ;;  %v905_v42 = vld [vmem:[#allocation2 + $0xb8] sm:$0xff]  ;;  %v4833_v18 = vand.u32 4294901760, %v4233_v35  ;;  %v4835_v55 = vand.u32 4294901760, %v4256_v30 }
 0x1d6   : > { %1958 = vmatpush.msra.mxu1 %v3965_v47  ;;  %v545_v15 = vsel %vm4827_vm8, %v3915_v21, %v540_v56  ;;  %v2081_v47 = vand.u32 4294901760, %v2080_v52  ;;  %v4359_v38 = vand.u32 4294901760, %v905_v42  ;;  %1689 = vmatmul.f32.gmra.mxu0 %v3851_v6  ;;  %v4408_v52 = vand.u32 4294901760, %v889_v51  ;;  %v4837_v56 = vld [vmem:[#allocation12_spill] sm:$0xff] }
 0x1d7   : > { %1780 = vmatmul.f32.vlgmr.msrb.gmra.mxu1 %v3539_v41  ;;  %1915 = vmatpush.msra.mxu0 %v4828_v43  ;;  %553 = vst [vmem:[#allocation2 + $0x28] sm:$0xf0] %v545_v15 }
 0x1d8   : > { %1960 = vmatpush.msra.mxu1 %v3975_v11  ;;  %2005 = vmatpush.msra.mxu2 %v4319_v13  ;;  %v4366_v21 = vsub.f32 %v905_v42, %v4359_v38  ;;  %v4830_v11 = vand.u32 4294901760, %v4111_v33  ;;  %v881_v42 = vld [vmem:[#allocation2 + $0x18] sm:$0xff] }
 0x1d9   : > { %2076 = vmatpush.msra.mxu3 %v2075_v39  ;;  %1919 = vmatpush.msra.mxu0 %v4829_v2  ;;  %v4839_v2 = vld [vmem:[#allocation16_spill] sm:$0xff] }
 0x1da   : > { %1962 = vmatpush.msra.mxu1 %v3982_v0  ;;  %2007 = vmatpush.msra.mxu2 %v4315_v31  ;;  %v2085_v45 = vand.u32 4294901760, %v4366_v21  ;;  %v4831_v0 = vand.u32 4294901760, %v4174_v22  ;;  %v4832_v22 = vand.u32 4294901760, %v4200_v57  ;;  %v4834_v57 = vand.u32 4294901760, %v4281_v49 }
 0x1db   : > { %2082 = vmatpush.msra.mxu3 %v2081_v47  ;;  %1923 = vmatpush.msra.mxu0 %v4830_v11  ;;  %v448_v48 = vpop.permute.xlu1 %447 }
 0x1dc   : > { %1964 = vmatpush.msra.mxu1 %v3991_v32  ;;  %2009 = vmatpush.msra.mxu2 %v4359_v38  ;;  %v897_v61 = vld [vmem:[#allocation2 + $0x140] sm:$0xff]  ;;  %v453_v54 = vsel %vm449_vm15, %v4152_v53, %v448_v48  ;;  %v2086_v32 = vsub.f32 %v4366_v21, %v2085_v45  ;;  %v4443_v48 = vand.u32 4294901760, %v881_v42 }
 0x1dd   : > { %1927 = vmatpush.msra.mxu0 %v4831_v0  ;;  %v4383_v33 = vand.u32 4294901760, %v897_v61  ;;  %1876 = vmatmul.f32.vlgmr.msrb.gmra.mxu3 %v4789_v60  ;;  %461 = vst [vmem:[#allocation2 + $0x60] sm:$0xf0] %v453_v54  ;;  %v424_v27 = vpop.permute.xlu0 %423 }
 0x1de   : > { %1966 = vmatpush.msra.mxu1 %v4011_v44  ;;  %v901_v44 = vld [vmem:[#allocation2 + $0x28] sm:$0xff]  ;;  %v429_v53 = vsel %vm425_vm5, %v4154_v12, %v424_v27  ;;  %v2087_v24 = vand.u32 4294901760, %v2086_v32  ;;  %1839 = vmatmul.f32.gmra.mxu2 %v3769_v19  ;;  %v4460_v27 = vsub.f32 %v881_v42, %v4443_v48  ;;  %vm4847_vm5 = vcmask 7168  }
 0x1df   : > { %1931 = vmatpush.msra.mxu0 %v4832_v22  ;;  %v4391_v14 = vand.u32 4294901760, %v901_v44  ;;  %1784 = vmatmul.f32.gmra.mxu1 %v3736_v36  ;;  %v4395_v28 = vsub.f32 %v897_v61, %v4383_v33  ;;  %437 = vst [vmem:[#allocation2 + $0x60] sm:$0xf] %v429_v53  ;;  %v4840_v61 = vld [vmem:[#allocation10_spill] sm:$0xff] }
 0x1e0   : > { %1968 = vmatpush.msra.mxu1 %v4069_v9  ;;  %2088 = vmatpush.msra.mxu3 %v2087_v24 }
 0x1e1   : > { %1935 = vmatpush.msra.mxu0 %v4833_v18  ;;  %2011 = vmatpush.msra.mxu2 %v4391_v14  ;;  %v4402_v9 = vsub.f32 %v901_v44, %v4391_v14  ;;  %v2097_v12 = vand.u32 4294901760, %v4395_v28  ;;  %v2121_v18 = vand.u32 4294901760, %v4460_v27 }
 0x1e2   : > { %1970 = vmatpush.msra.mxu1 %v4105_v1 }
 0x1e3   : > { %1939 = vmatpush.msra.mxu0 %v4834_v57  ;;  %2013 = vmatpush.msra.mxu2 %v4383_v33  ;;  %v2091_v35 = vand.u32 4294901760, %v4402_v9  ;;  %v354_v1 = vpop.permute.xlu1 %353  ;;  %v2098_v49 = vsub.f32 %v4395_v28, %v2097_v12 }
 0x1e4   : > { %1972 = vmatpush.msra.mxu1 %v4103_v20  ;;  %v359_v4 = vsel %vm355_vm3, %v4208_v29, %v354_v1  ;;  %v4428_v29 = vsub.f32 %v889_v51, %v4408_v52  ;;  %vm4838_vm3 = vmmov %vm4816_vm10  ;;  %v4841_v1 = vand.u32 4294901760, %v4226_v40 }
 0x1e5   : > { %1943 = vmatpush.msra.mxu0 %v4835_v55  ;;  %v2092_v20 = vsub.f32 %v4402_v9, %v2091_v35  ;;  %367 = vst [vmem:[#allocation2 + $0x48] sm:$0xf0] %v359_v4  ;;  %v330_v30 = vpop.permute.xlu0 %329  ;;  %v2122_v4 = vsub.f32 %v4460_v27, %v2121_v18 }
 0x1e6   : > { %1974 = vmatpush.msra.mxu1 %v4167_v34  ;;  %v4836_v34 = vld [vmem:[#allocation27_spill] sm:$0xff]  ;;  %v335_v39 = vsel %vm4838_vm3, %v4837_v56, %v330_v30  ;;  %v893_v15 = vld [vmem:[#allocation2 + $0x60] sm:$0xff]  ;;  %1945 = vmatmul.f32.vlgmr.msra.gmra.mxu0 %v3539_v41  ;;  %v2109_v0 = vand.u32 4294901760, %v4428_v29  ;;  %v4843_v30 = vand.u32 4294901760, %v4250_v7 }
 0x1e7   : > { %2138 = vmatpush.msrb.mxu0 %v4226_v40  ;;  %1882 = vmatmul.f32.gmra.mxu3 %v4836_v34  ;;  %v2093_v43 = vand.u32 4294901760, %v2092_v20  ;;  %343 = vst [vmem:[#allocation2 + $0x48] sm:$0xf] %v335_v39  ;;  %v4433_v47 = vand.u32 4294901760, %v893_v15  ;;  %v4842_v20 = vand.u32 4294901760, %v4240_v23  ;;  %v990_v40 = vpop.f32.mrf.mxu0  ;;  %v2123_v56 = vand.u32 4294901760, %v2122_v4  ;;  %v1089_v39 = vpop.f32.mrf.mxu1 }
 0x1e8   : > { %1976 = vmatpush.msra.mxu1 %v4192_v50  ;;  %v2099_v50 = vand.u32 4294901760, %v2098_v49  ;;  %v2110_v32 = vsub.f32 %v4428_v29, %v2109_v0 }
 0x1e9   : > { %2141 = vmatpush.msrb.mxu0 %v4240_v23  ;;  %2094 = vmatpush.msra.mxu3 %v2093_v43  ;;  %v4441_v11 = vsub.f32 %v893_v15, %v4433_v47  ;;  %v4844_v23 = vand.u32 4294901760, %v4264_v8  ;;  %v4846_v43 = vld [vmem:[#allocation6_spill] sm:$0xff] }
 0x1ea   : > { %1978 = vmatpush.msra.mxu1 %v4839_v2  ;;  %2015 = vmatpush.msra.mxu2 %v4433_v47  ;;  %v2111_v24 = vand.u32 4294901760, %v2110_v32  ;;  %v2352_v42 = vperm.slane %v4846_v43, 0 }
 0x1eb   : > { %2144 = vmatpush.msrb.mxu0 %v4250_v7  ;;  %2100 = vmatpush.msra.mxu3 %v2099_v50  ;;  %v2103_v54 = vand.u32 4294901760, %v4441_v11 }
 0x1ec   : > { %1980 = vmatpush.msra.mxu1 %v4269_v16  ;;  %2017 = vmatpush.msra.mxu2 %v4408_v52 }
 0x1ed   : > { %2147 = vmatpush.msrb.mxu0 %v4264_v8  ;;  %v2104_v16 = vsub.f32 %v4441_v11, %v2103_v54 }
 0x1ee   : > { %1982 = vmatpush.msra.mxu1 %v4840_v61  ;;  %v885_v22 = vld [vmem:[#allocation2 + $0x48] sm:$0xff]  ;;  %1949 = vmatmul.f32.gmra.mxu0 %v3736_v36 }
 0x1ef   : > { %1984 = vmatmul.f32.vlgmr.msra.gmra.mxu1 %v3539_v41  ;;  %2150 = vmatpush.msrb.mxu0 %v4267_v5  ;;  %v4463_v44 = vand.u32 4294901760, %v885_v22  ;;  %v2105_v53 = vand.u32 4294901760, %v2104_v16 }
 0x1f0   : > { %2192 = vmatpush.msrb.mxu1 %v4206_v62 }
 0x1f1   : > { %2153 = vmatpush.msrb.mxu0 %v4329_v63  ;;  %2019 = vmatpush.msra.mxu2 %v4463_v44  ;;  %v4470_v51 = vsub.f32 %v885_v22, %v4463_v44 }
 0x1f2   : > { %2194 = vmatpush.msrb.mxu1 %v4221_v46  ;;  %2106 = vmatpush.msra.mxu3 %v2105_v53  ;;  %v998_v7 = vpop.f32.mrf.mxu0 }
 0x1f3   : > { %2156 = vmatpush.msrb.mxu0 %v4326_v10  ;;  %2021 = vmatpush.msra.mxu2 %v4443_v48  ;;  %v2115_v57 = vand.u32 4294901760, %v4470_v51 }
 0x1f4   : > { %2196 = vmatpush.msrb.mxu1 %v4228_v3  ;;  %2112 = vmatpush.msra.mxu3 %v2111_v24 }
 0x1f5   : > { %2159 = vmatpush.msrb.mxu0 %v4366_v21  ;;  %2237 = vmatpush.msrb.mxu2 %v4841_v1  ;;  %v2116_v55 = vsub.f32 %v4470_v51, %v2115_v57 }
 0x1f6   : > { %2198 = vmatpush.msrb.mxu1 %v4242_v17  ;;  %2027 = vmatmul.f32.vlgmr.msra.gmra.mxu2 %v3619_v37  ;;  %v4845_v37 = vand.u32 4294901760, %v4267_v5  ;;  %v1090_v5 = vadd.f32 %v1089_v39, %v990_v40 }
 0x1f7   : > { %1988 = vmatmul.f32.gmra.mxu1 %v3736_v36  ;;  %2162 = vmatpush.msrb.mxu0 %v4402_v9  ;;  %v2117_v49 = vand.u32 4294901760, %v2116_v55 }
 0x1f8   : > { %2241 = vmatpush.msrb.mxu2 %v4842_v20  ;;  %2200 = vmatpush.msrb.mxu1 %v4246_v59 }
 0x1f9   : > { %2165 = vmatpush.msrb.mxu0 %v4395_v28  ;;  %2118 = vmatpush.msra.mxu3 %v2117_v49 }
 0x1fa   : > { %2245 = vmatpush.msrb.mxu2 %v4843_v30  ;;  %2202 = vmatpush.msrb.mxu1 %v4319_v13 }
 0x1fb   : > { %2168 = vmatpush.msrb.mxu0 %v4441_v11  ;;  %2124 = vmatpush.msra.mxu3 %v2123_v56 }
 0x1fc   : > { %2249 = vmatpush.msrb.mxu2 %v4844_v23  ;;  %2204 = vmatpush.msrb.mxu1 %v4315_v31 }
 0x1fd   : > { %2171 = vmatpush.msrb.mxu0 %v4428_v29  ;;  %2302 = vmatpush.msrb.mxu3 %v4206_v62  ;;  %v1093_v62 = vpop.f32.mrf.mxu1 }
 0x1fe   : > { %2253 = vmatpush.msrb.mxu2 %v4845_v37  ;;  %2206 = vmatpush.msrb.mxu1 %v4359_v38 }
 0x1ff   : > { %2174 = vmatpush.msrb.mxu0 %v4470_v51  ;;  %2304 = vmatpush.msrb.mxu3 %v4221_v46  ;;  %v1143_v46 = vpop.f32.mrf.mxu2 }
 0x200   : > { %2257 = vmatpush.msrb.mxu2 %v2073_v58  ;;  %2208 = vmatpush.msrb.mxu1 %v4391_v14 }
 0x201   : > { %2177 = vmatpush.msrb.mxu0 %v4460_v27  ;;  %2306 = vmatpush.msrb.mxu3 %v4228_v3  ;;  %v1144_v3 = vadd.f32 %v1143_v46, %v1090_v5 }
 0x202   : > { %2261 = vmatpush.msrb.mxu2 %v2079_v26  ;;  %2210 = vmatpush.msrb.mxu1 %v4383_v33 }
 0x203   : > { %2126 = vmatmul.f32.vlgmr.msra.gmra.mxu3 %v3539_v41  ;;  %2035 = vmatmul.f32.gmra.mxu2 %v3851_v6  ;;  %v1185_v6 = vpop.f32.mrf.mxu3 }
 0x204   : > { %2265 = vmatpush.msrb.mxu2 %v2085_v45  ;;  %2308 = vmatpush.msrb.mxu3 %v4242_v17 }
 0x205   : > { %2212 = vmatpush.msrb.mxu1 %v4433_v47  ;;  %2180 = vmatmul.f32.vlgmr.msrb.gmra.mxu0 %v4781_v25 }
 0x206   : > { %2269 = vmatpush.msrb.mxu2 %v2091_v35  ;;  %2310 = vmatpush.msrb.mxu3 %v4246_v59  ;;  %v1186_v59 = vadd.f32 %v1185_v6, %v1144_v3  ;;  %v1254_v25 = vpop.f32.mrf.mxu0 }
 0x207   : > { %2214 = vmatpush.msrb.mxu1 %v4408_v52 }
 0x208   : > { %2273 = vmatpush.msrb.mxu2 %v2097_v12  ;;  %2312 = vmatpush.msrb.mxu3 %v4319_v13  ;;  %v1255_v17 = vadd.f32 %v1254_v25, %v1186_v59  ;;  %v1148_v13 = vpop.f32.mrf.mxu2 }
 0x209   : > { %2216 = vmatpush.msrb.mxu1 %v4463_v44 }
 0x20a   : > { %2277 = vmatpush.msrb.mxu2 %v2103_v54  ;;  %2314 = vmatpush.msrb.mxu3 %v4315_v31 }
 0x20b   : > { %2218 = vmatpush.msrb.mxu1 %v4443_v48  ;;  %2130 = vmatmul.f32.gmra.mxu3 %v3736_v36 }
 0x20c   : > { %2281 = vmatpush.msrb.mxu2 %v2109_v0  ;;  %2316 = vmatpush.msrb.mxu3 %v4359_v38 }
 0x20d   : > { %2222 = vmatmul.f32.vlgmr.msrb.gmra.mxu1 %v4789_v60  ;;  %2185 = vmatmul.f32.gmra.mxu0 %v3769_v19  ;;  %v1094_v60 = vadd.f32 %v1093_v62, %v998_v7 }
 0x20e   : > { %2285 = vmatpush.msrb.mxu2 %v2115_v57  ;;  %2318 = vmatpush.msrb.mxu3 %v4391_v14 }
 0x20f   : > { %v1293_v8 = vpop.f32.mrf.mxu1  ;;  %v1149_v19 = vadd.f32 %v1148_v13, %v1094_v60 }
 0x210   : > { %2289 = vmatpush.msrb.mxu2 %v2121_v18  ;;  %2320 = vmatpush.msrb.mxu3 %v4383_v33  ;;  %v1294_v31 = vadd.f32 %v1293_v8, %v1255_v17 }
 0x211   : > { %2291 = vmatmul.f32.vlgmr.msrb.gmra.mxu2 %v3539_v41 }
 0x212   : > { %2322 = vmatpush.msrb.mxu3 %v4433_v47  ;;  %2341 = vst [vmem:[%s4546_s10] sm:$0xff] %v1294_v31 }
 0x214   : > { %2324 = vmatpush.msrb.mxu3 %v4408_v52 }
 0x215   : > { %2228 = vmatmul.f32.gmra.mxu1 %v4836_v34 }
 0x216   : > { %2326 = vmatpush.msrb.mxu3 %v4463_v44 }
 0x218   : > { %2328 = vmatpush.msrb.mxu3 %v4443_v48  ;;  %v2360_v48 = vmul.f32 %v2352_v42, %v1294_v31 }
 0x219   : > { %2295 = vmatmul.f32.gmra.mxu2 %v3736_v36  ;;  %2330 = vmatmul.f32.vlgmr.msrb.gmra.mxu3 %v3539_v41  ;;  %v1191_v10 = vpop.f32.mrf.mxu3  ;;  %v1258_v63 = vpop.f32.mrf.mxu0 }
 0x21a   : > { %v1192_v26 = vadd.f32 %v1191_v10, %v1149_v19 }
 0x21b   : > { %v1336_v58 = vpop.f32.mrf.mxu2 }
 0x21c   : > { %v1259_v38 = vadd.f32 %v1258_v63, %v1192_v26 }
 0x220   : > { %v1297_v45 = vpop.f32.mrf.mxu1 }
 0x221   : > { %2334 = vmatmul.f32.gmra.mxu3 %v3736_v36  ;;  %v1298_v14 = vadd.f32 %v1297_v45, %v1259_v38  ;;  %v2353_v36 = vperm.slane %v4846_v43, 1  ;;  %v2354_v45 = vperm.slane %v4846_v43, 2 }
 0x222   : > { %v1435_v21 = vpop.f32.mrf.mxu3  ;;  %v1489_v28 = vpop.f32.mrf.mxu0 }
 0x223   : > { %v1436_v33 = vadd.f32 %v1435_v21, %v1336_v58  ;;  %2345 = vst [vmem:[%s4546_s10 + $0x20] sm:$0xf] %v1298_v14  ;;  %v2364_v22 = vmul.f32 %v2352_v42, %v1298_v14 }
 0x224   : > { %v1344_v9 = vpop.f32.mrf.mxu2 }
 0x225   : > { %v1490_v12 = vadd.f32 %v1489_v28, %v1436_v33  ;;  %v2373_v24 = vsel %vm941_vm7, %v2364_v22, 0.0  ;;  %v2349_v22 = vld [vmem:[#allocation4] sm:$0xff] }
 0x228   : > { %v1531_v35 = vpop.f32.mrf.mxu1 }
 0x229   : > { %v1532_v34 = vadd.f32 %v1531_v35, %v1490_v12 }
 0x22a   : > { %v1439_v52 = vpop.f32.mrf.mxu3  ;;  %v1494_v15 = vpop.f32.mrf.mxu0 }
 0x22b   : > { %v1440_v41 = vadd.f32 %v1439_v52, %v1344_v9  ;;  %v2355_v52 = vperm.slane %v4846_v43, 3 }
 0x22c   : > { %v1600_v29 = vpop.f32.mrf.mxu2 }
 0x22d   : > { %v1601_v47 = vadd.f32 %v1600_v29, %v1532_v34  ;;  %v1495_v2 = vadd.f32 %v1494_v15, %v1440_v41 }
 0x230   : > { %v1537_v11 = vpop.f32.mrf.mxu1 }
 0x231   : > { %v1538_v54 = vadd.f32 %v1537_v11, %v1495_v2 }
 0x232   : > { %v1639_v50 = vpop.f32.mrf.mxu3 }
 0x233   : > { %v1640_v0 = vadd.f32 %v1639_v50, %v1601_v47 }
 0x234   : > { %v1604_v16 = vpop.f32.mrf.mxu2 }
 0x235   : > { %2342 = vst [vmem:[%s4546_s10 + $0x8] sm:$0xff] %v1640_v0  ;;  %v2361_v61 = vmul.f32 %v2353_v36, %v1640_v0  ;;  %v1605_v27 = vadd.f32 %v1604_v16, %v1538_v54 }
 0x237   : > { %v2368_v32 = vadd.f32 %v2361_v61, %v2360_v48 }
 0x23a   : > { %v1643_v44 = vpop.f32.mrf.mxu3 }
 0x23b   : > { %v1644_v53 = vadd.f32 %v1643_v44, %v1605_v27 }
 0x23d   : > { %2346 = vst [vmem:[%s4546_s10 + $0x28] sm:$0xf] %v1644_v53  ;;  %v2365_v51 = vmul.f32 %v2353_v36, %v1644_v53  ;;  %v2350_v53 = vld [vmem:[#allocation4 + $0x8] sm:$0xf] }
 0x23f   : > { %v2374_v18 = vsel %vm941_vm7, %v2365_v51, 0.0 }
 0x240   : > { %v2375_v57 = vadd.f32 %v2374_v18, %v2373_v24 }
 0x247   : > { %v1682_v1 = vpop.f32.mrf.mxu0 }
 0x24f   : > { %v1835_v40 = vpop.f32.mrf.mxu2 }
 0x253   : > { %v1690_v4 = vpop.f32.mrf.mxu0 }
 0x254   : > { %v1781_v55 = vpop.f32.mrf.mxu1 }
 0x255   : > { %v1782_v20 = vadd.f32 %v1781_v55, %v1682_v1 }
 0x257   : > { %v1836_v56 = vadd.f32 %v1835_v40, %v1782_v20 }
 0x25c   : > { %v1785_v49 = vpop.f32.mrf.mxu1 }
 0x25d   : > { %v1786_v39 = vadd.f32 %v1785_v49, %v1690_v4 }
 0x260   : > { %v1877_v30 = vpop.f32.mrf.mxu3 }
 0x261   : > { %v1878_v23 = vadd.f32 %v1877_v30, %v1836_v56  ;;  %v1840_v7 = vpop.f32.mrf.mxu2 }
 0x262   : > { %v1841_v46 = vadd.f32 %v1840_v7, %v1786_v39 }
 0x263   : > { %v1946_v37 = vpop.f32.mrf.mxu0 }
 0x264   : > { %v1947_v5 = vadd.f32 %v1946_v37, %v1878_v23 }
 0x26a   : > { %v1883_v3 = vpop.f32.mrf.mxu3 }
 0x26b   : > { %v1884_v59 = vadd.f32 %v1883_v3, %v1841_v46  ;;  %v1950_v25 = vpop.f32.mrf.mxu0 }
 0x26c   : > { %v1985_v62 = vpop.f32.mrf.mxu1 }
 0x26d   : > { %v1986_v6 = vadd.f32 %v1985_v62, %v1947_v5  ;;  %v1951_v17 = vadd.f32 %v1950_v25, %v1884_v59 }
 0x26f   : > { %2343 = vst [vmem:[%s4546_s10 + $0x10] sm:$0xff] %v1986_v6  ;;  %v2362_v9 = vmul.f32 %v2354_v45, %v1986_v6 }
 0x271   : > { %v2369_v42 = vadd.f32 %v2368_v32, %v2362_v9 }
 0x274   : > { %v1989_v8 = vpop.f32.mrf.mxu1 }
 0x275   : > { %v1990_v31 = vadd.f32 %v1989_v8, %v1951_v17 }
 0x277   : > { %2347 = vst [vmem:[%s4546_s10 + $0x30] sm:$0xf] %v1990_v31  ;;  %v2366_v36 = vmul.f32 %v2354_v45, %v1990_v31 }
 0x279   : > { %v2028_v60 = vpop.f32.mrf.mxu2  ;;  %v2376_v61 = vsel %vm941_vm7, %v2366_v36, 0.0 }
 0x27a   : > { %v2377_v54 = vadd.f32 %v2376_v61, %v2375_v57 }
 0x282   : > { %v2181_v10 = vpop.f32.mrf.mxu0 }
 0x286   : > { %v2127_v13 = vpop.f32.mrf.mxu3  ;;  %v2036_v19 = vpop.f32.mrf.mxu2 }
 0x287   : > { %v2128_v63 = vadd.f32 %v2127_v13, %v2028_v60 }
 0x289   : > { %v2182_v38 = vadd.f32 %v2181_v10, %v2128_v63 }
 0x28a   : > { %v2223_v26 = vpop.f32.mrf.mxu1  ;;  %v2186_v28 = vpop.f32.mrf.mxu0 }
 0x28b   : > { %v2224_v33 = vadd.f32 %v2223_v26, %v2182_v38 }
 0x28e   : > { %v2131_v58 = vpop.f32.mrf.mxu3 }
 0x28f   : > { %v2132_v14 = vadd.f32 %v2131_v58, %v2036_v19 }
 0x291   : > { %v2187_v34 = vadd.f32 %v2186_v28, %v2132_v14 }
 0x292   : > { %v2229_v29 = vpop.f32.mrf.mxu1 }
 0x293   : > { %v2230_v2 = vadd.f32 %v2229_v29, %v2187_v34 }
 0x294   : > { %v2292_v21 = vpop.f32.mrf.mxu2 }
 0x295   : > { %v2293_v12 = vadd.f32 %v2292_v21, %v2224_v33 }
 0x29c   : > { %v2331_v35 = vpop.f32.mrf.mxu3  ;;  %v2296_v47 = vpop.f32.mrf.mxu2 }
 0x29d   : > { %v2332_v41 = vadd.f32 %v2331_v35, %v2293_v12  ;;  %v2297_v11 = vadd.f32 %v2296_v47, %v2230_v2 }
 0x29f   : > { %2344 = vst [vmem:[%s4546_s10 + $0x18] sm:$0xff] %v2332_v41  ;;  %v2363_v15 = vmul.f32 %v2355_v52, %v2332_v41 }
 0x2a1   : > { %v2370_v50 = vadd.f32 %v2369_v42, %v2363_v15 }
 0x2a3   : > { %2371 = vadd.xlane.f32.xlu2 %v2370_v50 }
 0x2a4   : > { %v2335_v48 = vpop.f32.mrf.mxu3 }
 0x2a5   : > { %v2336_v0 = vadd.f32 %v2335_v48, %v2297_v11 }
 0x2a7   : > { %2348 = vst [vmem:[%s4546_s10 + $0x38] sm:$0xf] %v2336_v0  ;;  %v2367_v43 = vmul.f32 %v2355_v52, %v2336_v0 }
 0x2a9   : > { %v2378_v16 = vsel %vm941_vm7, %v2367_v43, 0.0 }
 0x2aa   : > { %v2379_v27 = vadd.f32 %v2378_v16, %v2377_v54 }
 0x2ac   : > { %2380 = vadd.xlane.f32.xlu0 %v2379_v27 }
 0x316   : > { %v2372_v44 = vpop.xlane.xlu2 %2371 }
 0x317   : > { %v2382_v32 = vadd.f32 %v2372_v44, %v2349_v22 }
 0x319   : > { %2384 = vst.msk [vmem:[#allocation4] sm:$0xff] %vm4847_vm5, %v2382_v32 }
 0x31f   : > { %v2381_v24 = vpop.xlane.xlu0 %2380 }
 0x320   : > { %v2383_v51 = vadd.f32 %v2381_v24, %v2350_v53 }
 0x322   : > { %2386 = vst.msk [vmem:[#allocation4 + $0x8] sm:$0xf] %vm2385_vm9, %v2383_v51 }
 0x323 PF: > { %p2701_p11 = scmp.ne.s32.totalorder %s2820_s16, 1 }
 0x324   : > { %s2716_s27 = sshll.u32 (!%p2701_p11), %s2816_s15, 6 }
 0x325   : > { %2390 = sbr.rel (%p2701_p11) target bundleno = 1075 (0x433), region = 48  ;;  %s2393_s28 = scalar_lea.vmem (!%p2701_p11), [#allocation3], %s2716_s27 }
 0x32a   : > { %v2403_v18 = vld [vmem:[#allocation4 + $0x8] sm:$0xf]  ;;  %v2859_v57 = vmov 0   ;;  %v2402_v55 = vld [vmem:[#allocation4] sm:$0xff]  ;;  %v2396_v46 = vld [vmem:[%s2393_s28 + $0x10] sm:$0xff]  ;;  %vm2456_vm7 = vcmask 1043456  }
 0x32b   : > { %2786 = vset.pattern.permute.xlu0 %v2859_v57  ;;  %v2405_v1 = vmul.f32 0.001953125, %v2403_v18  ;;  %v2404_v4 = vmul.f32 0.001953125, %v2402_v55  ;;  %v2398_v49 = vld [vmem:[%s2393_s28 + $0x20] sm:$0xf]  ;;  %v2399_v40 = vld [vmem:[%s2393_s28 + $0x28] sm:$0xf] }
 0x32c   : > { %v4848_v23 = vld [vmem:[#allocation6_spill] sm:$0xff]  ;;  %v2395_v7 = vld [vmem:[%s2393_s28 + $0x8] sm:$0xff]  ;;  %v2397_v3 = vld [vmem:[%s2393_s28 + $0x18] sm:$0xff]  ;;  %vm2468_vm14 = vcmask 7168   ;;  %vm2470_vm15 = vcmask 3072  }
 0x32d   : > { %2413 = vperm.xlu0 %2786, %v2405_v1   ;;  %v2425_v39 = vperm.slane %v4848_v23, 0  ;;  %v2426_v37 = vperm.slane %v4848_v23, 1  ;;  %v2394_v5 = vld [vmem:[%s2393_s28] sm:$0xff]  ;;  %v2400_v62 = vld [vmem:[%s2393_s28 + $0x30] sm:$0xf]  ;;  %v2427_v59 = vperm.slane %v4848_v23, 2 }
 0x32e   : > { %v2401_v10 = vld [vmem:[%s2393_s28 + $0x38] sm:$0xf]  ;;  %v2428_v58 = vperm.slane %v4848_v23, 3  ;;  %v2441_v43 = vld [vmem:[#allocation5] sm:$0xff] }
 0x32f   : > { %v2442_v27 = vld [vmem:[#allocation5 + $0x8] sm:$0xf] }
 0x335   : > { %2408 = vperm.xlu0 %2786, %v2404_v4  }
 0x39f   : > { %v2414_v20 = vpop.permute.xlu0 %2413 }
 0x3a0   : > { %v2420_v30 = vsub.f32 %v2398_v49, %v2414_v20  ;;  %v2421_v56 = vsub.f32 %v2399_v40, %v2414_v20  ;;  %v2422_v19 = vsub.f32 %v2400_v62, %v2414_v20  ;;  %v2423_v9 = vsub.f32 %v2401_v10, %v2414_v20 }
 0x3a2   : > { %v2437_v25 = vmul.f32 %v2425_v39, %v2420_v30  ;;  %v2438_v17 = vmul.f32 %v2426_v37, %v2421_v56  ;;  %v2439_v12 = vmul.f32 %v2427_v59, %v2422_v19  ;;  %v2440_v42 = vmul.f32 %v2428_v58, %v2423_v9 }
 0x3a4   : > { %v2447_v21 = vmul.f32 %v2437_v25, %v2437_v25  ;;  %v2448_v45 = vmul.f32 %v2438_v17, %v2438_v17  ;;  %v2449_v47 = vmul.f32 %v2439_v12, %v2439_v12  ;;  %v2450_v50 = vmul.f32 %v2440_v42, %v2440_v42 }
 0x3a6   : > { %v2457_v34 = vsel %vm2456_vm7, %v2447_v21, 0.0  ;;  %v2458_v41 = vsel %vm2456_vm7, %v2448_v45, 0.0  ;;  %v2460_v11 = vsel %vm2456_vm7, %v2449_v47, 0.0  ;;  %v2462_v0 = vsel %vm2456_vm7, %v2450_v50, 0.0 }
 0x3a7   : > { %v2409_v6 = vpop.permute.xlu0 %2408  ;;  %v2459_v2 = vadd.f32 %v2458_v41, %v2457_v34 }
 0x3a8   : > { %v2416_v8 = vsub.f32 %v2394_v5, %v2409_v6  ;;  %v2417_v31 = vsub.f32 %v2395_v7, %v2409_v6  ;;  %v2418_v60 = vsub.f32 %v2396_v46, %v2409_v6  ;;  %v2419_v13 = vsub.f32 %v2397_v3, %v2409_v6 }
 0x3a9   : > { %v2461_v48 = vadd.f32 %v2460_v11, %v2459_v2 }
 0x3aa   : > { %v2433_v63 = vmul.f32 %v2425_v39, %v2416_v8  ;;  %v2434_v26 = vmul.f32 %v2426_v37, %v2417_v31  ;;  %v2435_v38 = vmul.f32 %v2427_v59, %v2418_v60  ;;  %v2436_v33 = vmul.f32 %v2428_v58, %v2419_v13 }
 0x3ab   : > { %v2463_v61 = vadd.f32 %v2462_v0, %v2461_v48 }
 0x3ac   : > { %v2443_v14 = vmul.f32 %v2433_v63, %v2433_v63  ;;  %v2444_v28 = vmul.f32 %v2434_v26, %v2434_v26  ;;  %v2445_v52 = vmul.f32 %v2435_v38, %v2435_v38  ;;  %v2446_v29 = vmul.f32 %v2436_v33, %v2436_v33 }
 0x3ae   : > { %v2451_v35 = vadd.f32 %v2444_v28, %v2443_v14 }
 0x3b0   : > { %v2452_v15 = vadd.f32 %v2451_v35, %v2445_v52 }
 0x3b2   : > { %v2453_v36 = vadd.f32 %v2452_v15, %v2446_v29 }
 0x3b4   : > { %2454 = vadd.xlane.f32.xlu1 %v2453_v36 }
 0x3bc   : > { %2464 = vadd.xlane.f32.xlu1 %v2463_v61 }
 0x427   : > { %v2455_v54 = vpop.xlane.xlu1 %2454 }
 0x428   : > { %v2466_v16 = vadd.f32 %v2455_v54, %v2441_v43 }
 0x42a   : > { %2469 = vst.msk [vmem:[#allocation5] sm:$0xff] %vm2468_vm14, %v2466_v16 }
 0x42f   : > { %v2465_v22 = vpop.xlane.xlu1 %2464 }
 0x430   : > { %v2467_v44 = vadd.f32 %v2465_v22, %v2442_v27 }
 0x432   : > { %2471 = vst.msk [vmem:[#allocation5 + $0x8] sm:$0xf] %vm2470_vm15, %v2467_v44 }
 0x433 PF: > { %p2704_p12 = scmp.ne.s32.totalorder %s2820_s16, 2 }
 0x434   : > { %s2717_s25 = sshll.u32 (!%p2704_p12), %s2816_s15, 6 }
 0x435   : > { %2475 = sbr.rel (%p2704_p12) target bundleno = 1244 (0x4dc), region = 52  ;;  %s2478_s14 = scalar_lea.vmem (!%p2704_p12), [#allocation3], %s2717_s25 }
 0x43a   : > { %v2491_v32 = vld [vmem:[#allocation5] sm:$0xff]  ;;  %v2860_v53 = vmov 0   ;;  %v2492_v51 = vld [vmem:[#allocation5 + $0x8] sm:$0xf]  ;;  %v2709_v55 = vld [vmem:[%s4627_s3 + $0x20] sm:$0xff] }
 0x43b   : > { %2787 = vset.pattern.permute.xlu0 %v2860_v53  ;;  %v2493_v24 = vmul.f32 0.001953125, %v2491_v32  ;;  %2788 = vset.pattern.permute.xlu1 %v2860_v53  ;;  %v2494_v18 = vmul.f32 0.001953125, %v2492_v51  ;;  %v2710_v20 = vld [vmem:[%s4627_s3 + $0x28] sm:$0xf]  ;;  %v2487_v7 = vld [vmem:[#allocation4] sm:$0xff]  ;;  %v2707_v13 = vld [vmem:[%s4627_s3 + $0x10] sm:$0xff] }
 0x43c   : > { %2789 = vset.pattern.permute.xlu2 %v2860_v53  ;;  %v2517_v62 = vld [vmem:[%s4627_s3] sm:$0xff]  ;;  %v2489_v6 = vmul.f32 0.001953125, %v2487_v7  ;;  %v2518_v17 = vld [vmem:[%s4627_s3 + $0x8] sm:$0xf]  ;;  %v2708_v38 = vld [vmem:[%s4627_s3 + $0x18] sm:$0xf] }
 0x43d   : > { %v2495_v57 = vadd.f32 1e-05, %v2493_v24  ;;  %v2496_v1 = vadd.f32 1e-05, %v2494_v18  ;;  %2577 = vperm.xlu2 %2789, %v2709_v55   ;;  %v2488_v8 = vld [vmem:[#allocation4 + $0x8] sm:$0xf] }
 0x43e   : > { %v2490_v63 = vmul.f32 0.001953125, %v2488_v8  ;;  %v2479_v45 = vld [vmem:[%s2478_s14] sm:$0xff]  ;;  %v2480_v33 = vld [vmem:[%s2478_s14 + $0x8] sm:$0xff]  ;;  %v2481_v14 = vld [vmem:[%s2478_s14 + $0x10] sm:$0xff] }
 0x43f   : > { %2790 = vrsqrt.f32 %v2495_v57  ;;  %vm2503_vm0 = vweird.f32 %v2495_v57  ;;  %vm2513_vm2 = vweird.f32 %v2496_v1  ;;  %v2482_v28 = vld [vmem:[%s2478_s14 + $0x18] sm:$0xff]  ;;  %v2483_v2 = vld [vmem:[%s2478_s14 + $0x20] sm:$0xf]  ;;  %v2484_v43 = vld [vmem:[%s2478_s14 + $0x28] sm:$0xf] }
 0x440   : > { %2792 = vrsqrt.f32 %v2496_v1  ;;  %v2485_v54 = vld [vmem:[%s2478_s14 + $0x30] sm:$0xf]  ;;  %v2486_v16 = vld [vmem:[%s2478_s14 + $0x38] sm:$0xf] }
 0x445   : > { %v2791_v4 = vpop.eup %2790  ;;  %2582 = vperm.xlu2 %2789, %v2710_v20  }
 0x446   : > { %v2793_v49 = vpop.eup %2792  ;;  %v2498_v40 = vmul.f32 %v2791_v4, %v2495_v57  ;;  %vm2504_vm1 = vweird.f32 %v2791_v4 }
 0x447   : > { %v2508_v30 = vmul.f32 %v2793_v49, %v2496_v1  ;;  %vm2514_vm12 = vweird.f32 %v2793_v49  ;;  %vm2505_vm13 = vmor %vm2503_vm0, %vm2504_vm1 }
 0x448   : > { %v2499_v56 = vmul.f32 %v2791_v4, %v2498_v40  ;;  %vm2515_vm11 = vmor %vm2513_vm2, %vm2514_vm12 }
 0x449   : > { %v2509_v23 = vmul.f32 %v2793_v49, %v2508_v30 }
 0x44a   : > { %v2500_v39 = vmul.f32 0.5, %v2499_v56 }
 0x44b   : > { %v2510_v37 = vmul.f32 0.5, %v2509_v23 }
 0x44c   : > { %v2501_v5 = vsub.f32 1.5, %v2500_v39 }
 0x44d   : > { %v2511_v46 = vsub.f32 1.5, %v2510_v37 }
 0x44e   : > { %v2502_v3 = vmul.f32 %v2791_v4, %v2501_v5 }
 0x44f   : > { %v2512_v59 = vmul.f32 %v2793_v49, %v2511_v46 }
 0x450   : > { %v2506_v25 = vsel %vm2505_vm13, %v2791_v4, %v2502_v3 }
 0x451   : > { %v2519_v31 = vmul.f32 %v2517_v62, %v2506_v25  ;;  %v2516_v60 = vsel %vm2515_vm11, %v2793_v49, %v2512_v59 }
 0x452   : > { %v2520_v10 = vmul.f32 %v2518_v17, %v2516_v60 }
 0x453   : > { %2530 = vperm.xlu0 %2787, %v2519_v31   ;;  %v2524_v19 = vmul.f32 %v2519_v31, %v2489_v6 }
 0x454   : > { %v2525_v58 = vmul.f32 %v2520_v10, %v2490_v63 }
 0x455   : > { %v2526_v26 = vsub.f32 %v2707_v13, %v2524_v19 }
 0x456   : > { %v2527_v21 = vsub.f32 %v2708_v38, %v2525_v58 }
 0x457   : > { %2548 = vperm.xlu1 %2788, %v2526_v26  }
 0x45b   : > { %2535 = vperm.xlu0 %2787, %v2520_v10  }
 0x45f   : > { %2553 = vperm.xlu1 %2788, %v2527_v21  }
 0x497   : > { %v2578_v29 = vpop.permute.xlu2 %2577 }
 0x49f   : > { %v2583_v49 = vpop.permute.xlu2 %2582 }
 0x4c5   : > { %v2531_v9 = vpop.permute.xlu0 %2530 }
 0x4c6   : > { %v2538_v12 = vmul.f32 %v2531_v9, %v2479_v45  ;;  %v2539_v52 = vmul.f32 %v2531_v9, %v2480_v33  ;;  %v2540_v35 = vmul.f32 %v2531_v9, %v2481_v14  ;;  %v2541_v34 = vmul.f32 %v2531_v9, %v2482_v28 }
 0x4c9   : > { %v2549_v41 = vpop.permute.xlu1 %2548 }
 0x4ca   : > { %v2556_v15 = vadd.f32 %v2549_v41, %v2538_v12  ;;  %v2557_v42 = vadd.f32 %v2549_v41, %v2539_v52  ;;  %v2558_v47 = vadd.f32 %v2549_v41, %v2540_v35  ;;  %v2559_v36 = vadd.f32 %v2549_v41, %v2541_v34 }
 0x4cc   : > { %vm2564_vm4 = vcmp.ge.f32.partialorder %v2556_v15, 0.0  ;;  %vm2565_vm10 = vcmp.ge.f32.partialorder %v2557_v42, 0.0  ;;  %vm2566_vm6 = vcmp.ge.f32.partialorder %v2558_v47, 0.0  ;;  %vm2567_vm8 = vcmp.ge.f32.partialorder %v2559_v36, 0.0 }
 0x4cd   : > { %v2585_v50 = vmul.f32 %v2578_v29, %v2556_v15  ;;  %v2586_v11 = vmul.f32 %v2578_v29, %v2557_v42  ;;  %v2587_v48 = vmul.f32 %v2578_v29, %v2558_v47  ;;  %v2588_v0 = vmul.f32 %v2578_v29, %v2559_v36  ;;  %v2536_v61 = vpop.permute.xlu0 %2535 }
 0x4ce   : > { %v2542_v32 = vmul.f32 %v2536_v61, %v2483_v2  ;;  %v2543_v24 = vmul.f32 %v2536_v61, %v2484_v43  ;;  %v2544_v51 = vmul.f32 %v2536_v61, %v2485_v54  ;;  %v2545_v18 = vmul.f32 %v2536_v61, %v2486_v16 }
 0x4cf   : > { %v2593_v27 = vsel %vm2564_vm4, %v2556_v15, %v2585_v50  ;;  %v2594_v22 = vsel %vm2565_vm10, %v2557_v42, %v2586_v11  ;;  %v2595_v44 = vsel %vm2566_vm6, %v2558_v47, %v2587_v48  ;;  %v2596_v53 = vsel %vm2567_vm8, %v2559_v36, %v2588_v0 }
 0x4d0   : > { %2601 = vst [vmem:[%s2937_s7] sm:$0xff] %v2593_v27 }
 0x4d1   : > { %2602 = vst [vmem:[%s2937_s7 + $0x8] sm:$0xff] %v2594_v22  ;;  %v2554_v57 = vpop.permute.xlu1 %2553 }
 0x4d2   : > { %2603 = vst [vmem:[%s2937_s7 + $0x10] sm:$0xff] %v2595_v44  ;;  %v2560_v1 = vadd.f32 %v2554_v57, %v2542_v32  ;;  %v2561_v55 = vadd.f32 %v2554_v57, %v2543_v24  ;;  %v2562_v4 = vadd.f32 %v2554_v57, %v2544_v51  ;;  %v2563_v20 = vadd.f32 %v2554_v57, %v2545_v18 }
 0x4d3   : > { %2604 = vst [vmem:[%s2937_s7 + $0x18] sm:$0xff] %v2596_v53 }
 0x4d4   : > { %vm2568_vm3 = vcmp.ge.f32.partialorder %v2560_v1, 0.0  ;;  %vm2569_vm5 = vcmp.ge.f32.partialorder %v2561_v55, 0.0  ;;  %vm2570_vm9 = vcmp.ge.f32.partialorder %v2562_v4, 0.0  ;;  %vm2571_vm7 = vcmp.ge.f32.partialorder %v2563_v20, 0.0 }
 0x4d5   : > { %v2589_v40 = vmul.f32 %v2583_v49, %v2560_v1  ;;  %v2590_v30 = vmul.f32 %v2583_v49, %v2561_v55  ;;  %v2591_v56 = vmul.f32 %v2583_v49, %v2562_v4  ;;  %v2592_v23 = vmul.f32 %v2583_v49, %v2563_v20 }
 0x4d7   : > { %v2597_v39 = vsel %vm2568_vm3, %v2560_v1, %v2589_v40  ;;  %v2598_v37 = vsel %vm2569_vm5, %v2561_v55, %v2590_v30  ;;  %v2599_v5 = vsel %vm2570_vm9, %v2562_v4, %v2591_v56  ;;  %v2600_v7 = vsel %vm2571_vm7, %v2563_v20, %v2592_v23 }
 0x4d8   : > { %2605 = vst [vmem:[%s2937_s7 + $0x20] sm:$0xf] %v2597_v39 }
 0x4d9   : > { %2606 = vst [vmem:[%s2937_s7 + $0x28] sm:$0xf] %v2598_v37 }
 0x4da   : > { %2607 = vst [vmem:[%s2937_s7 + $0x30] sm:$0xf] %v2599_v5 }
 0x4db   : > { %2608 = vst [vmem:[%s2937_s7 + $0x38] sm:$0xf] %v2600_v7 }
 0x4dc PF: > { %s14_s19 = sadd.s32 1, %s2832_s19   ;;  %s4849_s15 = smov %s2824_s17 }
 0x4dd   : > { %p11_p13 = scmp.ge.s32.totalorder %s14_s19, 8   ;;  %s4850_s16 = smov %s2828_s18 }
 0x4de   : > { %s4851_s17 = smov %s4854_s20  ;;  %s4852_s18 = smov %s4858_s21 }
 0x4df   :  { %13 = sbr.rel (!%p11_p13) target bundleno = 3 (0x3), region = 87 }

</bundles_post_ra>
